<compile_context>
chip_gen: v7x
topology: tpu7x:2x2x1
jax: 0.10.0
libtpu: 0.0.40
codegen_flags: <defaults>
</compile_context>

<pallas_src>
import functools

import jax
import jax.numpy as jnp
import numpy as np
from jax.experimental import pallas as pl
from jax.experimental.pallas import tpu as pltpu


# ----------------------------- Pallas kernel ------------------------------- #

def _mqa_layer_kernel(x_ref, wq_ref, wkv_ref, wo_ref, w1_ref, w3_ref, w2_ref,
                      g1_ref, g2_ref, cosq_ref, sinq_ref, cosk_ref, sink_ref,
                      out_ref, kv_ref,
                      *, batch, seq, nhead, head_dim, is_causal, eps):
    f32 = jnp.float32
    bf16 = jnp.bfloat16
    hd = head_dim
    S = seq
    D = nhead * hd

    x = x_ref[...]                                    # (B*S, D) f32

    def rmsnorm(v, g):
        ms = jnp.mean(v * v, axis=-1, keepdims=True)
        return g * (v * jax.lax.rsqrt(ms + eps))

    # --------------------------- attention -------------------------------- #
    h1 = rmsnorm(x, g1_ref[...])                      # (BS, D) f32
    h1b = h1.astype(bf16)

    # Fused Q projection: [Wq | swap_neg(Wq)] -> (BS, 2D).
    qq = jnp.dot(h1b, wq_ref[...], preferred_element_type=f32)
    q, q_swp = qq[:, :D], qq[:, D:]
    # Whole-slab, lane-dense RoPE (1/sqrt(hd) folded into cosq/sinq).
    q_rot = q * cosq_ref[...] + q_swp * sinq_ref[...]          # (BS, D) f32

    # Fused K / K_swapped / V projection -> (BS, 3*hd).
    kkv = jnp.dot(h1b, wkv_ref[...], preferred_element_type=f32)
    k, k_swp, v = kkv[:, :hd], kkv[:, hd:2 * hd], kkv[:, 2 * hd:]
    k_rot = k * cosk_ref[...] + k_swp * sink_ref[...]          # interleaved layout

    # Single lane-dense KV-cache output block: [K_rot | V] (wrapper slices it).
    kv_ref[...] = jnp.concatenate([k_rot, v], axis=-1)

    if is_causal:
        row = jax.lax.broadcasted_iota(jnp.int32, (S, S), 0)
        col = jax.lax.broadcasted_iota(jnp.int32, (S, S), 1)
        causal_mask = col <= row                                 # hoisted once

    q_b16 = q_rot.astype(bf16)
    k_b16 = k_rot.astype(bf16)
    v_b16 = v.astype(bf16)

    # Per-(batch, head) score / PV core.  B*nhead is tiny here; switch to
    # lax.fori_loop(unroll=2..4) with hoisted k/v/mask once it grows.
    batch_outs = []
    for b in range(batch):
        r0 = b * S
        kb = k_b16[r0:r0 + S, :]                                 # (S, hd)
        vb = v_b16[r0:r0 + S, :]
        head_outs = []
        for h in range(nhead):
            qh = q_b16[r0:r0 + S, h * hd:(h + 1) * hd]           # contiguous slice
            s = jax.lax.dot_general(qh, kb, (((1,), (1,)), ((), ())),
                                    preferred_element_type=f32)  # (S, S)
            if is_causal:
                s = jnp.where(causal_mask, s, -1e30)
            m = jnp.max(s, axis=-1, keepdims=True)
            p = jnp.exp(s - m)
            l = jnp.sum(p, axis=-1, keepdims=True)
            # deferred normalization: scale the (S,hd) output, not (S,S) probs
            oh = jnp.dot(p.astype(bf16), vb, preferred_element_type=f32)
            head_outs.append((oh * pl.reciprocal(l, approx=True)).astype(bf16))
        batch_outs.append(jnp.concatenate(head_outs, axis=-1))   # (S, D) bf16
    attn = jnp.concatenate(batch_outs, axis=0)                   # (BS, D) bf16

    # Single D-wide output projection over the whole batch-folded slab.
    x1 = x + jnp.dot(attn, wo_ref[...], preferred_element_type=f32)   # residual 1

    # ------------------------ SwiGLU feed-forward -------------------------- #
    h2 = rmsnorm(x1, g2_ref[...])
    h2b = h2.astype(bf16)
    a = jnp.dot(h2b, w1_ref[...], preferred_element_type=f32)
    up = jnp.dot(h2b, w3_ref[...], preferred_element_type=f32)
    gated = (a * jax.nn.sigmoid(a)) * up                          # f32 elementwise
    ff = jnp.dot(gated.astype(bf16), w2_ref[...], preferred_element_type=f32)
    out_ref[...] = x1 + ff                                        # residual 2


# ------------------------------- glue / wrapper ----------------------------- #

def _pairswap_neg_cols(w):
    """Column map: out[:, 2j] = -w[:, 2j+1]; out[:, 2j+1] = w[:, 2j] (trace-time)."""
    we, wo = w[:, 0::2], w[:, 1::2]
    return jnp.stack([-wo, we], axis=-1).reshape(w.shape)


def mqa_encoder_layer(src, params, freqs_cos, freqs_sin, *, nhead, is_causal=False):
    """src: (B, S, D) f32; freqs_cos/sin: (S, head_dim//2). Returns (out, (k, v))."""
    B, S, D = src.shape
    hd = D // nhead
    BS = B * S
    scale = 1.0 / float(np.sqrt(hd))
    bf16 = jnp.bfloat16

    # Rotation partner folded into the projection weights (free at trace time).
    wq_cat = jnp.concatenate(
        [params["wqt"], _pairswap_neg_cols(params["wqt"])], axis=1).astype(bf16)   # (D, 2D)
    wkv_cat = jnp.concatenate(
        [params["wkt"], _pairswap_neg_cols(params["wkt"]), params["wvt"]],
        axis=1).astype(bf16)                                                        # (D, 3*hd)
    wo = params["wot"].astype(bf16)
    w1 = params["w1t"].astype(bf16)
    w3 = params["w3t"].astype(bf16)
    w2 = params["w2t"].astype(bf16)
    g1 = params["g1"].astype(jnp.float32)
    g2 = params["g2"].astype(jnp.float32)

    # Full-width cos/sin tables (pairwise-repeated, tiled over heads & batch);
    # the attention scale is folded into the Q tables.
    cos_pair = jnp.repeat(freqs_cos.astype(jnp.float32), 2, axis=-1)   # (S, hd)
    sin_pair = jnp.repeat(freqs_sin.astype(jnp.float32), 2, axis=-1)
    cos_q = jnp.tile(jnp.tile(cos_pair * scale, (1, nhead)), (B, 1))   # (BS, D)
    sin_q = jnp.tile(jnp.tile(sin_pair * scale, (1, nhead)), (B, 1))
    cos_k = jnp.tile(cos_pair, (B, 1))                                 # (BS, hd)
    sin_k = jnp.tile(sin_pair, (B, 1))

    x2d = src.reshape(BS, D)       # batch folded into the GEMM M dimension

    def full(a):
        nd = a.ndim
        return pl.BlockSpec(a.shape, lambda i, nd=nd: (0,) * nd)

    kernel = functools.partial(_mqa_layer_kernel, batch=B, seq=S, nhead=nhead,
                               head_dim=hd, is_causal=is_causal, eps=1e-6)

    inputs = (x2d, wq_cat, wkv_cat, wo, w1, w3, w2, g1, g2,
              cos_q, sin_q, cos_k, sin_k)

    out2d, kv2d = pl.pallas_call(
        kernel,
        out_shape=(jax.ShapeDtypeStruct((BS, D), jnp.float32),
                   jax.ShapeDtypeStruct((BS, 2 * hd), jnp.float32)),
        grid=(1,),
        in_specs=[full(a) for a in inputs],
        out_specs=(pl.BlockSpec((BS, D), lambda i: (0, 0)),
                   pl.BlockSpec((BS, 2 * hd), lambda i: (0, 0))),
        compiler_params=pltpu.CompilerParams(
            dimension_semantics=("arbitrary",),
            vmem_limit_bytes=64 * 1024 * 1024),
    )(*inputs)

    out = out2d.reshape(B, S, D)
    kv = kv2d.reshape(B, S, 2 * hd)
    # K leaves the kernel already in the module's interleaved RoPE layout --
    # no wrapper-side gather / re-interleave pass over HBM.
    k_cache = kv[:, :, :hd][:, None]       # (B, 1, S, hd)
    v_cache = kv[:, :, hd:][:, None]       # (B, 1, S, hd)
    return out, (k_cache, v_cache)


# ------------------------- pure-JAX reference (check) ----------------------- #

def _rmsnorm_ref(x, g, eps=1e-6):
    return g.reshape(-1) * (x * jax.lax.rsqrt(jnp.mean(x * x, axis=-1, keepdims=True) + eps))


def _rope_ref(t, cos, sin):
    te, to = t[..., 0::2], t[..., 1::2]
    oe = te * cos - to * sin
    oo = te * sin + to * cos
    return jnp.stack([oe, oo], axis=-1).reshape(t.shape)


def reference(src, params, cos, sin, nhead, is_causal):
    B, S, D = src.shape
    hd = D // nhead
    h1 = _rmsnorm_ref(src, params["g1"])
    q = (h1 @ params["wqt"]).reshape(B, S, nhead, hd).transpose(0, 2, 1, 3)
    k = _rope_ref(h1 @ params["wkt"], cos, sin)
    v = h1 @ params["wvt"]
    q = _rope_ref(q, cos, sin)
    s = jnp.einsum("bhqd,bkd->bhqk", q, k) / (hd ** 0.5)
    if is_causal:
        r = jnp.arange(S)[:, None]
        c = jnp.arange(S)[None, :]
        s = jnp.where(c <= r, s, -jnp.inf)
    p = jax.nn.softmax(s, axis=-1)
    attn = jnp.einsum("bhqk,bkd->bhqd", p, v).transpose(0, 2, 1, 3).reshape(B, S, D)
    x1 = src + attn @ params["wot"]
    h2 = _rmsnorm_ref(x1, params["g2"])
    ff = (jax.nn.silu(h2 @ params["w1t"]) * (h2 @ params["w3t"])) @ params["w2t"]
    return x1 + ff, k[:, None], v[:, None]


# ------------------------------------ main ---------------------------------- #

if __name__ == "__main__":
    B, S, D, H, FF = 2, 8, 32, 4, 64
    hd = D // H

    key = jax.random.PRNGKey(0)
    ks = jax.random.split(key, 10)
    init = lambda k, shp: (0.05 * jax.random.normal(k, shp, jnp.float32))

    params = {
        "wqt": init(ks[0], (D, D)),     # Wq^T
        "wkt": init(ks[1], (D, hd)),    # Wk^T
        "wvt": init(ks[2], (D, hd)),    # Wv^T
        "wot": init(ks[3], (D, D)),     # Wo^T
        "w1t": init(ks[4], (D, FF)),    # w1^T
        "w3t": init(ks[5], (D, FF)),    # w3^T
        "w2t": init(ks[6], (FF, D)),    # linear2^T
        "g1": (1.0 + 0.1 * jax.random.normal(ks[7], (1, D), jnp.float32)),
        "g2": (1.0 + 0.1 * jax.random.normal(ks[8], (1, D), jnp.float32)),
    }
    src = jax.random.normal(ks[9], (B, S, D), jnp.float32)

    # RoPE frequencies (equivalent of precomputed complex freqs_cis (S, hd//2)).
    half = hd // 2
    inv_freq = 1.0 / (10000.0 ** (np.arange(half, dtype=np.float64) * 2.0 / hd))
    ang = np.outer(np.arange(S, dtype=np.float64), inv_freq)
    freqs_cos = jnp.asarray(np.cos(ang), jnp.float32)
    freqs_sin = jnp.asarray(np.sin(ang), jnp.float32)

    out, (k_cache, v_cache) = mqa_encoder_layer(
        src, params, freqs_cos, freqs_sin, nhead=H, is_causal=True)
    out = jax.block_until_ready(out)
    k_cache = jax.block_until_ready(k_cache)
    v_cache = jax.block_until_ready(v_cache)

    ref_out, ref_k, ref_v = reference(src, params, freqs_cos, freqs_sin, H, True)
    # bf16 MXU operands + approx reciprocal -> tolerance that still catches any
    # structural / layout error (which would be O(1) wrong).
    np.testing.assert_allclose(np.asarray(out), np.asarray(ref_out), rtol=2e-2, atol=2e-2)
    np.testing.assert_allclose(np.asarray(k_cache), np.asarray(ref_k), rtol=2e-2, atol=2e-2)
    np.testing.assert_allclose(np.asarray(v_cache), np.asarray(ref_v), rtol=2e-2, atol=2e-2)

    print("KERNEL_OK")
</pallas_src>

<mosaic_0001>
module attributes {stable_mosaic.version = 11 : i64} {
  func.func @_mqa_layer_kernel(%arg0: i32, %arg1: memref<16x32xf32, #tpu.memory_space<vmem>>, %arg2: memref<32x64xbf16, #tpu.memory_space<vmem>>, %arg3: memref<32x24xbf16, #tpu.memory_space<vmem>>, %arg4: memref<32x32xbf16, #tpu.memory_space<vmem>>, %arg5: memref<32x64xbf16, #tpu.memory_space<vmem>>, %arg6: memref<32x64xbf16, #tpu.memory_space<vmem>>, %arg7: memref<64x32xbf16, #tpu.memory_space<vmem>>, %arg8: memref<1x32xf32, #tpu.memory_space<vmem>>, %arg9: memref<1x32xf32, #tpu.memory_space<vmem>>, %arg10: memref<16x32xf32, #tpu.memory_space<vmem>>, %arg11: memref<16x32xf32, #tpu.memory_space<vmem>>, %arg12: memref<16x8xf32, #tpu.memory_space<vmem>>, %arg13: memref<16x8xf32, #tpu.memory_space<vmem>>, %arg14: memref<16x32xf32, #tpu.memory_space<vmem>>, %arg15: memref<16x16xf32, #tpu.memory_space<vmem>>) attributes {dimension_semantics = [#tpu.dimension_semantics<arbitrary>], iteration_bounds = array<i64: 1>, scalar_prefetch = 0 : i64, scratch_operands = 0 : i64, tpu.core_type = #tpu.core_type<tc>, window_params = [{pipeline_mode = #tpu.pipeline_mode<synchronous>, transform_indices = @transform_0, window_bounds = array<i64: 16, 32>}, {pipeline_mode = #tpu.pipeline_mode<synchronous>, transform_indices = @transform_1, window_bounds = array<i64: 32, 64>}, {pipeline_mode = #tpu.pipeline_mode<synchronous>, transform_indices = @transform_2, window_bounds = array<i64: 32, 24>}, {pipeline_mode = #tpu.pipeline_mode<synchronous>, transform_indices = @transform_3, window_bounds = array<i64: 32, 32>}, {pipeline_mode = #tpu.pipeline_mode<synchronous>, transform_indices = @transform_4, window_bounds = array<i64: 32, 64>}, {pipeline_mode = #tpu.pipeline_mode<synchronous>, transform_indices = @transform_5, window_bounds = array<i64: 32, 64>}, {pipeline_mode = #tpu.pipeline_mode<synchronous>, transform_indices = @transform_6, window_bounds = array<i64: 64, 32>}, {pipeline_mode = #tpu.pipeline_mode<synchronous>, transform_indices = @transform_7, window_bounds = array<i64: 1, 32>}, {pipeline_mode = #tpu.pipeline_mode<synchronous>, transform_indices = @transform_8, window_bounds = array<i64: 1, 32>}, {pipeline_mode = #tpu.pipeline_mode<synchronous>, transform_indices = @transform_9, window_bounds = array<i64: 16, 32>}, {pipeline_mode = #tpu.pipeline_mode<synchronous>, transform_indices = @transform_10, window_bounds = array<i64: 16, 32>}, {pipeline_mode = #tpu.pipeline_mode<synchronous>, transform_indices = @transform_11, window_bounds = array<i64: 16, 8>}, {pipeline_mode = #tpu.pipeline_mode<synchronous>, transform_indices = @transform_12, window_bounds = array<i64: 16, 8>}, {pipeline_mode = #tpu.pipeline_mode<synchronous>, transform_indices = @transform_13, window_bounds = array<i64: 16, 32>}, {pipeline_mode = #tpu.pipeline_mode<synchronous>, transform_indices = @transform_14, window_bounds = array<i64: 16, 16>}]} {
    %c0 = arith.constant 0 : index
    %c0_0 = arith.constant 0 : index
    %0 = vector.load %arg1[%c0, %c0_0] : memref<16x32xf32, #tpu.memory_space<vmem>>, vector<16x32xf32>
    %c0_1 = arith.constant 0 : index
    %c0_2 = arith.constant 0 : index
    %1 = vector.load %arg8[%c0_1, %c0_2] : memref<1x32xf32, #tpu.memory_space<vmem>>, vector<1x32xf32>
    %2 = arith.mulf %0, %0 : vector<16x32xf32>
    %cst = arith.constant dense<0.000000e+00> : vector<16xf32>
    %3 = vector.multi_reduction <add>, %2, %cst [1] : vector<16x32xf32> to vector<16xf32>
    %4 = vector.shape_cast %3 : vector<16xf32> to vector<16x1xf32>
    %cst_3 = arith.constant 3.200000e+01 : f32
    %5 = vector.broadcast %cst_3 : f32 to vector<16x1xf32>
    %6 = arith.divf %4, %5 : vector<16x1xf32>
    %cst_4 = arith.constant 9.99999997E-7 : f32
    %7 = vector.broadcast %cst_4 : f32 to vector<16x1xf32>
    %8 = arith.addf %6, %7 : vector<16x1xf32>
    %9 = math.rsqrt %8 : vector<16x1xf32>
    %10 = vector.broadcast %9 : vector<16x1xf32> to vector<16x32xf32>
    %11 = arith.mulf %0, %10 : vector<16x32xf32>
    %12 = vector.broadcast %1 : vector<1x32xf32> to vector<16x32xf32>
    %13 = arith.mulf %12, %11 : vector<16x32xf32>
    %14 = arith.truncf %13 : vector<16x32xf32> to vector<16x32xbf16>
    %c0_5 = arith.constant 0 : index
    %c0_6 = arith.constant 0 : index
    %15 = vector.load %arg2[%c0_5, %c0_6] : memref<32x64xbf16, #tpu.memory_space<vmem>>, vector<32x64xbf16>
    %cst_7 = arith.constant dense<0.000000e+00> : vector<16x64xf32>
    %16 = tpu.matmul %14, %15, %cst_7 {dimension_numbers = #tpu.dot_dimension_numbers<[1], [0], [0], [1], [0, 0, 1, 1], [], []>} : vector<16x32xbf16>, vector<32x64xbf16>, vector<16x64xf32> -> vector<16x64xf32>
    %17 = vector.extract_strided_slice %16 {offsets = [0, 0], sizes = [16, 32], strides = [1, 1]} : vector<16x64xf32> to vector<16x32xf32>
    %18 = vector.extract_strided_slice %16 {offsets = [0, 32], sizes = [16, 32], strides = [1, 1]} : vector<16x64xf32> to vector<16x32xf32>
    %c0_8 = arith.constant 0 : index
    %c0_9 = arith.constant 0 : index
    %19 = vector.load %arg10[%c0_8, %c0_9] : memref<16x32xf32, #tpu.memory_space<vmem>>, vector<16x32xf32>
    %20 = arith.mulf %17, %19 : vector<16x32xf32>
    %c0_10 = arith.constant 0 : index
    %c0_11 = arith.constant 0 : index
    %21 = vector.load %arg11[%c0_10, %c0_11] : memref<16x32xf32, #tpu.memory_space<vmem>>, vector<16x32xf32>
    %22 = arith.mulf %18, %21 : vector<16x32xf32>
    %23 = arith.addf %20, %22 : vector<16x32xf32>
    %c0_12 = arith.constant 0 : index
    %c0_13 = arith.constant 0 : index
    %24 = vector.load %arg3[%c0_12, %c0_13] : memref<32x24xbf16, #tpu.memory_space<vmem>>, vector<32x24xbf16>
    %cst_14 = arith.constant dense<0.000000e+00> : vector<16x24xf32>
    %25 = tpu.matmul %14, %24, %cst_14 {dimension_numbers = #tpu.dot_dimension_numbers<[1], [0], [0], [1], [0, 0, 1, 1], [], []>} : vector<16x32xbf16>, vector<32x24xbf16>, vector<16x24xf32> -> vector<16x24xf32>
    %26 = vector.extract_strided_slice %25 {offsets = [0, 0], sizes = [16, 8], strides = [1, 1]} : vector<16x24xf32> to vector<16x8xf32>
    %27 = vector.extract_strided_slice %25 {offsets = [0, 8], sizes = [16, 8], strides = [1, 1]} : vector<16x24xf32> to vector<16x8xf32>
    %28 = vector.extract_strided_slice %25 {offsets = [0, 16], sizes = [16, 8], strides = [1, 1]} : vector<16x24xf32> to vector<16x8xf32>
    %c0_15 = arith.constant 0 : index
    %c0_16 = arith.constant 0 : index
    %29 = vector.load %arg12[%c0_15, %c0_16] : memref<16x8xf32, #tpu.memory_space<vmem>>, vector<16x8xf32>
    %30 = arith.mulf %26, %29 : vector<16x8xf32>
    %c0_17 = arith.constant 0 : index
    %c0_18 = arith.constant 0 : index
    %31 = vector.load %arg13[%c0_17, %c0_18] : memref<16x8xf32, #tpu.memory_space<vmem>>, vector<16x8xf32>
    %32 = arith.mulf %27, %31 : vector<16x8xf32>
    %33 = arith.addf %30, %32 : vector<16x8xf32>
    %34 = tpu.concatenate %33, %28 in 1 : vector<16x8xf32>, vector<16x8xf32> -> vector<16x16xf32>
    %c0_19 = arith.constant 0 : index
    %c0_20 = arith.constant 0 : index
    %35 = vector.load %arg15[%c0_19, %c0_20] : memref<16x16xf32, #tpu.memory_space<vmem>>, vector<16x16xf32>
    tpu.vector_store %arg15[%c0_19, %c0_20], %34 {strides = array<i32>} : memref<16x16xf32, #tpu.memory_space<vmem>>, vector<16x16xf32>,
    %36 = tpu.iota {dimensions = array<i32: 0>} : vector<8x8xi32>
    %37 = tpu.iota {dimensions = array<i32: 1>} : vector<8x8xi32>
    %38 = arith.cmpi sle, %37, %36 : vector<8x8xi32>
    %39 = arith.truncf %23 : vector<16x32xf32> to vector<16x32xbf16>
    %40 = arith.truncf %33 : vector<16x8xf32> to vector<16x8xbf16>
    %41 = arith.truncf %28 : vector<16x8xf32> to vector<16x8xbf16>
    %42 = vector.extract_strided_slice %40 {offsets = [0, 0], sizes = [8, 8], strides = [1, 1]} : vector<16x8xbf16> to vector<8x8xbf16>
    %43 = vector.extract_strided_slice %41 {offsets = [0, 0], sizes = [8, 8], strides = [1, 1]} : vector<16x8xbf16> to vector<8x8xbf16>
    %44 = vector.extract_strided_slice %39 {offsets = [0, 0], sizes = [8, 8], strides = [1, 1]} : vector<16x32xbf16> to vector<8x8xbf16>
    %cst_21 = arith.constant dense<0.000000e+00> : vector<8x8xf32>
    %45 = tpu.matmul %44, %42, %cst_21 {dimension_numbers = #tpu.dot_dimension_numbers<[1], [1], [0], [0], [0, 0, 1, 0], [], []>} : vector<8x8xbf16>, vector<8x8xbf16>, vector<8x8xf32> -> vector<8x8xf32>
    %cst_22 = arith.constant -1.000000e+30 : f32
    %46 = vector.broadcast %cst_22 : f32 to vector<8x8xf32>
    %47 = arith.select %38, %45, %46 : vector<8x8xi1>, vector<8x8xf32>
    %cst_23 = arith.constant dense<0xFF800000> : vector<8xf32>
    %48 = vector.multi_reduction <maximumf>, %47, %cst_23 [1] : vector<8x8xf32> to vector<8xf32>
    %49 = vector.shape_cast %48 : vector<8xf32> to vector<8x1xf32>
    %50 = vector.broadcast %49 : vector<8x1xf32> to vector<8x8xf32>
    %51 = arith.subf %47, %50 : vector<8x8xf32>
    %52 = math.exp %51 : vector<8x8xf32>
    %cst_24 = arith.constant dense<0.000000e+00> : vector<8xf32>
    %53 = vector.multi_reduction <add>, %52, %cst_24 [1] : vector<8x8xf32> to vector<8xf32>
    %54 = vector.shape_cast %53 : vector<8xf32> to vector<8x1xf32>
    %55 = arith.truncf %52 : vector<8x8xf32> to vector<8x8xbf16>
    %cst_25 = arith.constant dense<0.000000e+00> : vector<8x8xf32>
    %56 = tpu.matmul %55, %43, %cst_25 {dimension_numbers = #tpu.dot_dimension_numbers<[1], [0], [0], [1], [0, 0, 1, 1], [], []>} : vector<8x8xbf16>, vector<8x8xbf16>, vector<8x8xf32> -> vector<8x8xf32>
    %57 = tpu.reciprocal %54 {approx = true} : vector<8x1xf32> -> vector<8x1xf32>
    %58 = vector.broadcast %57 : vector<8x1xf32> to vector<8x8xf32>
    %59 = arith.mulf %56, %58 : vector<8x8xf32>
    %60 = arith.truncf %59 : vector<8x8xf32> to vector<8x8xbf16>
    %61 = vector.extract_strided_slice %39 {offsets = [0, 8], sizes = [8, 8], strides = [1, 1]} : vector<16x32xbf16> to vector<8x8xbf16>
    %cst_26 = arith.constant dense<0.000000e+00> : vector<8x8xf32>
    %62 = tpu.matmul %61, %42, %cst_26 {dimension_numbers = #tpu.dot_dimension_numbers<[1], [1], [0], [0], [0, 0, 1, 0], [], []>} : vector<8x8xbf16>, vector<8x8xbf16>, vector<8x8xf32> -> vector<8x8xf32>
    %cst_27 = arith.constant -1.000000e+30 : f32
    %63 = vector.broadcast %cst_27 : f32 to vector<8x8xf32>
    %64 = arith.select %38, %62, %63 : vector<8x8xi1>, vector<8x8xf32>
    %cst_28 = arith.constant dense<0xFF800000> : vector<8xf32>
    %65 = vector.multi_reduction <maximumf>, %64, %cst_28 [1] : vector<8x8xf32> to vector<8xf32>
    %66 = vector.shape_cast %65 : vector<8xf32> to vector<8x1xf32>
    %67 = vector.broadcast %66 : vector<8x1xf32> to vector<8x8xf32>
    %68 = arith.subf %64, %67 : vector<8x8xf32>
    %69 = math.exp %68 : vector<8x8xf32>
    %cst_29 = arith.constant dense<0.000000e+00> : vector<8xf32>
    %70 = vector.multi_reduction <add>, %69, %cst_29 [1] : vector<8x8xf32> to vector<8xf32>
    %71 = vector.shape_cast %70 : vector<8xf32> to vector<8x1xf32>
    %72 = arith.truncf %69 : vector<8x8xf32> to vector<8x8xbf16>
    %cst_30 = arith.constant dense<0.000000e+00> : vector<8x8xf32>
    %73 = tpu.matmul %72, %43, %cst_30 {dimension_numbers = #tpu.dot_dimension_numbers<[1], [0], [0], [1], [0, 0, 1, 1], [], []>} : vector<8x8xbf16>, vector<8x8xbf16>, vector<8x8xf32> -> vector<8x8xf32>
    %74 = tpu.reciprocal %71 {approx = true} : vector<8x1xf32> -> vector<8x1xf32>
    %75 = vector.broadcast %74 : vector<8x1xf32> to vector<8x8xf32>
    %76 = arith.mulf %73, %75 : vector<8x8xf32>
    %77 = arith.truncf %76 : vector<8x8xf32> to vector<8x8xbf16>
    %78 = vector.extract_strided_slice %39 {offsets = [0, 16], sizes = [8, 8], strides = [1, 1]} : vector<16x32xbf16> to vector<8x8xbf16>
    %cst_31 = arith.constant dense<0.000000e+00> : vector<8x8xf32>
    %79 = tpu.matmul %78, %42, %cst_31 {dimension_numbers = #tpu.dot_dimension_numbers<[1], [1], [0], [0], [0, 0, 1, 0], [], []>} : vector<8x8xbf16>, vector<8x8xbf16>, vector<8x8xf32> -> vector<8x8xf32>
    %cst_32 = arith.constant -1.000000e+30 : f32
    %80 = vector.broadcast %cst_32 : f32 to vector<8x8xf32>
    %81 = arith.select %38, %79, %80 : vector<8x8xi1>, vector<8x8xf32>
    %cst_33 = arith.constant dense<0xFF800000> : vector<8xf32>
    %82 = vector.multi_reduction <maximumf>, %81, %cst_33 [1] : vector<8x8xf32> to vector<8xf32>
    %83 = vector.shape_cast %82 : vector<8xf32> to vector<8x1xf32>
    %84 = vector.broadcast %83 : vector<8x1xf32> to vector<8x8xf32>
    %85 = arith.subf %81, %84 : vector<8x8xf32>
    %86 = math.exp %85 : vector<8x8xf32>
    %cst_34 = arith.constant dense<0.000000e+00> : vector<8xf32>
    %87 = vector.multi_reduction <add>, %86, %cst_34 [1] : vector<8x8xf32> to vector<8xf32>
    %88 = vector.shape_cast %87 : vector<8xf32> to vector<8x1xf32>
    %89 = arith.truncf %86 : vector<8x8xf32> to vector<8x8xbf16>
    %cst_35 = arith.constant dense<0.000000e+00> : vector<8x8xf32>
    %90 = tpu.matmul %89, %43, %cst_35 {dimension_numbers = #tpu.dot_dimension_numbers<[1], [0], [0], [1], [0, 0, 1, 1], [], []>} : vector<8x8xbf16>, vector<8x8xbf16>, vector<8x8xf32> -> vector<8x8xf32>
    %91 = tpu.reciprocal %88 {approx = true} : vector<8x1xf32> -> vector<8x1xf32>
    %92 = vector.broadcast %91 : vector<8x1xf32> to vector<8x8xf32>
    %93 = arith.mulf %90, %92 : vector<8x8xf32>
    %94 = arith.truncf %93 : vector<8x8xf32> to vector<8x8xbf16>
    %95 = vector.extract_strided_slice %39 {offsets = [0, 24], sizes = [8, 8], strides = [1, 1]} : vector<16x32xbf16> to vector<8x8xbf16>
    %cst_36 = arith.constant dense<0.000000e+00> : vector<8x8xf32>
    %96 = tpu.matmul %95, %42, %cst_36 {dimension_numbers = #tpu.dot_dimension_numbers<[1], [1], [0], [0], [0, 0, 1, 0], [], []>} : vector<8x8xbf16>, vector<8x8xbf16>, vector<8x8xf32> -> vector<8x8xf32>
    %cst_37 = arith.constant -1.000000e+30 : f32
    %97 = vector.broadcast %cst_37 : f32 to vector<8x8xf32>
    %98 = arith.select %38, %96, %97 : vector<8x8xi1>, vector<8x8xf32>
    %cst_38 = arith.constant dense<0xFF800000> : vector<8xf32>
    %99 = vector.multi_reduction <maximumf>, %98, %cst_38 [1] : vector<8x8xf32> to vector<8xf32>
    %100 = vector.shape_cast %99 : vector<8xf32> to vector<8x1xf32>
    %101 = vector.broadcast %100 : vector<8x1xf32> to vector<8x8xf32>
    %102 = arith.subf %98, %101 : vector<8x8xf32>
    %103 = math.exp %102 : vector<8x8xf32>
    %cst_39 = arith.constant dense<0.000000e+00> : vector<8xf32>
    %104 = vector.multi_reduction <add>, %103, %cst_39 [1] : vector<8x8xf32> to vector<8xf32>
    %105 = vector.shape_cast %104 : vector<8xf32> to vector<8x1xf32>
    %106 = arith.truncf %103 : vector<8x8xf32> to vector<8x8xbf16>
    %cst_40 = arith.constant dense<0.000000e+00> : vector<8x8xf32>
    %107 = tpu.matmul %106, %43, %cst_40 {dimension_numbers = #tpu.dot_dimension_numbers<[1], [0], [0], [1], [0, 0, 1, 1], [], []>} : vector<8x8xbf16>, vector<8x8xbf16>, vector<8x8xf32> -> vector<8x8xf32>
    %108 = tpu.reciprocal %105 {approx = true} : vector<8x1xf32> -> vector<8x1xf32>
    %109 = vector.broadcast %108 : vector<8x1xf32> to vector<8x8xf32>
    %110 = arith.mulf %107, %109 : vector<8x8xf32>
    %111 = arith.truncf %110 : vector<8x8xf32> to vector<8x8xbf16>
    %112 = tpu.concatenate %60, %77, %94, %111 in 1 : vector<8x8xbf16>, vector<8x8xbf16>, vector<8x8xbf16>, vector<8x8xbf16> -> vector<8x32xbf16>
    %113 = vector.extract_strided_slice %40 {offsets = [8, 0], sizes = [8, 8], strides = [1, 1]} : vector<16x8xbf16> to vector<8x8xbf16>
    %114 = vector.extract_strided_slice %41 {offsets = [8, 0], sizes = [8, 8], strides = [1, 1]} : vector<16x8xbf16> to vector<8x8xbf16>
    %115 = vector.extract_strided_slice %39 {offsets = [8, 0], sizes = [8, 8], strides = [1, 1]} : vector<16x32xbf16> to vector<8x8xbf16>
    %cst_41 = arith.constant dense<0.000000e+00> : vector<8x8xf32>
    %116 = tpu.matmul %115, %113, %cst_41 {dimension_numbers = #tpu.dot_dimension_numbers<[1], [1], [0], [0], [0, 0, 1, 0], [], []>} : vector<8x8xbf16>, vector<8x8xbf16>, vector<8x8xf32> -> vector<8x8xf32>
    %cst_42 = arith.constant -1.000000e+30 : f32
    %117 = vector.broadcast %cst_42 : f32 to vector<8x8xf32>
    %118 = arith.select %38, %116, %117 : vector<8x8xi1>, vector<8x8xf32>
    %cst_43 = arith.constant dense<0xFF800000> : vector<8xf32>
    %119 = vector.multi_reduction <maximumf>, %118, %cst_43 [1] : vector<8x8xf32> to vector<8xf32>
    %120 = vector.shape_cast %119 : vector<8xf32> to vector<8x1xf32>
    %121 = vector.broadcast %120 : vector<8x1xf32> to vector<8x8xf32>
    %122 = arith.subf %118, %121 : vector<8x8xf32>
    %123 = math.exp %122 : vector<8x8xf32>
    %cst_44 = arith.constant dense<0.000000e+00> : vector<8xf32>
    %124 = vector.multi_reduction <add>, %123, %cst_44 [1] : vector<8x8xf32> to vector<8xf32>
    %125 = vector.shape_cast %124 : vector<8xf32> to vector<8x1xf32>
    %126 = arith.truncf %123 : vector<8x8xf32> to vector<8x8xbf16>
    %cst_45 = arith.constant dense<0.000000e+00> : vector<8x8xf32>
    %127 = tpu.matmul %126, %114, %cst_45 {dimension_numbers = #tpu.dot_dimension_numbers<[1], [0], [0], [1], [0, 0, 1, 1], [], []>} : vector<8x8xbf16>, vector<8x8xbf16>, vector<8x8xf32> -> vector<8x8xf32>
    %128 = tpu.reciprocal %125 {approx = true} : vector<8x1xf32> -> vector<8x1xf32>
    %129 = vector.broadcast %128 : vector<8x1xf32> to vector<8x8xf32>
    %130 = arith.mulf %127, %129 : vector<8x8xf32>
    %131 = arith.truncf %130 : vector<8x8xf32> to vector<8x8xbf16>
    %132 = vector.extract_strided_slice %39 {offsets = [8, 8], sizes = [8, 8], strides = [1, 1]} : vector<16x32xbf16> to vector<8x8xbf16>
    %cst_46 = arith.constant dense<0.000000e+00> : vector<8x8xf32>
    %133 = tpu.matmul %132, %113, %cst_46 {dimension_numbers = #tpu.dot_dimension_numbers<[1], [1], [0], [0], [0, 0, 1, 0], [], []>} : vector<8x8xbf16>, vector<8x8xbf16>, vector<8x8xf32> -> vector<8x8xf32>
    %cst_47 = arith.constant -1.000000e+30 : f32
    %134 = vector.broadcast %cst_47 : f32 to vector<8x8xf32>
    %135 = arith.select %38, %133, %134 : vector<8x8xi1>, vector<8x8xf32>
    %cst_48 = arith.constant dense<0xFF800000> : vector<8xf32>
    %136 = vector.multi_reduction <maximumf>, %135, %cst_48 [1] : vector<8x8xf32> to vector<8xf32>
    %137 = vector.shape_cast %136 : vector<8xf32> to vector<8x1xf32>
    %138 = vector.broadcast %137 : vector<8x1xf32> to vector<8x8xf32>
    %139 = arith.subf %135, %138 : vector<8x8xf32>
    %140 = math.exp %139 : vector<8x8xf32>
    %cst_49 = arith.constant dense<0.000000e+00> : vector<8xf32>
    %141 = vector.multi_reduction <add>, %140, %cst_49 [1] : vector<8x8xf32> to vector<8xf32>
    %142 = vector.shape_cast %141 : vector<8xf32> to vector<8x1xf32>
    %143 = arith.truncf %140 : vector<8x8xf32> to vector<8x8xbf16>
    %cst_50 = arith.constant dense<0.000000e+00> : vector<8x8xf32>
    %144 = tpu.matmul %143, %114, %cst_50 {dimension_numbers = #tpu.dot_dimension_numbers<[1], [0], [0], [1], [0, 0, 1, 1], [], []>} : vector<8x8xbf16>, vector<8x8xbf16>, vector<8x8xf32> -> vector<8x8xf32>
    %145 = tpu.reciprocal %142 {approx = true} : vector<8x1xf32> -> vector<8x1xf32>
    %146 = vector.broadcast %145 : vector<8x1xf32> to vector<8x8xf32>
    %147 = arith.mulf %144, %146 : vector<8x8xf32>
    %148 = arith.truncf %147 : vector<8x8xf32> to vector<8x8xbf16>
    %149 = vector.extract_strided_slice %39 {offsets = [8, 16], sizes = [8, 8], strides = [1, 1]} : vector<16x32xbf16> to vector<8x8xbf16>
    %cst_51 = arith.constant dense<0.000000e+00> : vector<8x8xf32>
    %150 = tpu.matmul %149, %113, %cst_51 {dimension_numbers = #tpu.dot_dimension_numbers<[1], [1], [0], [0], [0, 0, 1, 0], [], []>} : vector<8x8xbf16>, vector<8x8xbf16>, vector<8x8xf32> -> vector<8x8xf32>
    %cst_52 = arith.constant -1.000000e+30 : f32
    %151 = vector.broadcast %cst_52 : f32 to vector<8x8xf32>
    %152 = arith.select %38, %150, %151 : vector<8x8xi1>, vector<8x8xf32>
    %cst_53 = arith.constant dense<0xFF800000> : vector<8xf32>
    %153 = vector.multi_reduction <maximumf>, %152, %cst_53 [1] : vector<8x8xf32> to vector<8xf32>
    %154 = vector.shape_cast %153 : vector<8xf32> to vector<8x1xf32>
    %155 = vector.broadcast %154 : vector<8x1xf32> to vector<8x8xf32>
    %156 = arith.subf %152, %155 : vector<8x8xf32>
    %157 = math.exp %156 : vector<8x8xf32>
    %cst_54 = arith.constant dense<0.000000e+00> : vector<8xf32>
    %158 = vector.multi_reduction <add>, %157, %cst_54 [1] : vector<8x8xf32> to vector<8xf32>
    %159 = vector.shape_cast %158 : vector<8xf32> to vector<8x1xf32>
    %160 = arith.truncf %157 : vector<8x8xf32> to vector<8x8xbf16>
    %cst_55 = arith.constant dense<0.000000e+00> : vector<8x8xf32>
    %161 = tpu.matmul %160, %114, %cst_55 {dimension_numbers = #tpu.dot_dimension_numbers<[1], [0], [0], [1], [0, 0, 1, 1], [], []>} : vector<8x8xbf16>, vector<8x8xbf16>, vector<8x8xf32> -> vector<8x8xf32>
    %162 = tpu.reciprocal %159 {approx = true} : vector<8x1xf32> -> vector<8x1xf32>
    %163 = vector.broadcast %162 : vector<8x1xf32> to vector<8x8xf32>
    %164 = arith.mulf %161, %163 : vector<8x8xf32>
    %165 = arith.truncf %164 : vector<8x8xf32> to vector<8x8xbf16>
    %166 = vector.extract_strided_slice %39 {offsets = [8, 24], sizes = [8, 8], strides = [1, 1]} : vector<16x32xbf16> to vector<8x8xbf16>
    %cst_56 = arith.constant dense<0.000000e+00> : vector<8x8xf32>
    %167 = tpu.matmul %166, %113, %cst_56 {dimension_numbers = #tpu.dot_dimension_numbers<[1], [1], [0], [0], [0, 0, 1, 0], [], []>} : vector<8x8xbf16>, vector<8x8xbf16>, vector<8x8xf32> -> vector<8x8xf32>
    %cst_57 = arith.constant -1.000000e+30 : f32
    %168 = vector.broadcast %cst_57 : f32 to vector<8x8xf32>
    %169 = arith.select %38, %167, %168 : vector<8x8xi1>, vector<8x8xf32>
    %cst_58 = arith.constant dense<0xFF800000> : vector<8xf32>
    %170 = vector.multi_reduction <maximumf>, %169, %cst_58 [1] : vector<8x8xf32> to vector<8xf32>
    %171 = vector.shape_cast %170 : vector<8xf32> to vector<8x1xf32>
    %172 = vector.broadcast %171 : vector<8x1xf32> to vector<8x8xf32>
    %173 = arith.subf %169, %172 : vector<8x8xf32>
    %174 = math.exp %173 : vector<8x8xf32>
    %cst_59 = arith.constant dense<0.000000e+00> : vector<8xf32>
    %175 = vector.multi_reduction <add>, %174, %cst_59 [1] : vector<8x8xf32> to vector<8xf32>
    %176 = vector.shape_cast %175 : vector<8xf32> to vector<8x1xf32>
    %177 = arith.truncf %174 : vector<8x8xf32> to vector<8x8xbf16>
    %cst_60 = arith.constant dense<0.000000e+00> : vector<8x8xf32>
    %178 = tpu.matmul %177, %114, %cst_60 {dimension_numbers = #tpu.dot_dimension_numbers<[1], [0], [0], [1], [0, 0, 1, 1], [], []>} : vector<8x8xbf16>, vector<8x8xbf16>, vector<8x8xf32> -> vector<8x8xf32>
    %179 = tpu.reciprocal %176 {approx = true} : vector<8x1xf32> -> vector<8x1xf32>
    %180 = vector.broadcast %179 : vector<8x1xf32> to vector<8x8xf32>
    %181 = arith.mulf %178, %180 : vector<8x8xf32>
    %182 = arith.truncf %181 : vector<8x8xf32> to vector<8x8xbf16>
    %183 = tpu.concatenate %131, %148, %165, %182 in 1 : vector<8x8xbf16>, vector<8x8xbf16>, vector<8x8xbf16>, vector<8x8xbf16> -> vector<8x32xbf16>
    %184 = tpu.concatenate %112, %183 in 0 : vector<8x32xbf16>, vector<8x32xbf16> -> vector<16x32xbf16>
    %c0_61 = arith.constant 0 : index
    %c0_62 = arith.constant 0 : index
    %185 = vector.load %arg4[%c0_61, %c0_62] : memref<32x32xbf16, #tpu.memory_space<vmem>>, vector<32x32xbf16>
    %cst_63 = arith.constant dense<0.000000e+00> : vector<16x32xf32>
    %186 = tpu.matmul %184, %185, %cst_63 {dimension_numbers = #tpu.dot_dimension_numbers<[1], [0], [0], [1], [0, 0, 1, 1], [], []>} : vector<16x32xbf16>, vector<32x32xbf16>, vector<16x32xf32> -> vector<16x32xf32>
    %187 = arith.addf %0, %186 : vector<16x32xf32>
    %c0_64 = arith.constant 0 : index
    %c0_65 = arith.constant 0 : index
    %188 = vector.load %arg9[%c0_64, %c0_65] : memref<1x32xf32, #tpu.memory_space<vmem>>, vector<1x32xf32>
    %189 = arith.mulf %187, %187 : vector<16x32xf32>
    %cst_66 = arith.constant dense<0.000000e+00> : vector<16xf32>
    %190 = vector.multi_reduction <add>, %189, %cst_66 [1] : vector<16x32xf32> to vector<16xf32>
    %191 = vector.shape_cast %190 : vector<16xf32> to vector<16x1xf32>
    %cst_67 = arith.constant 3.200000e+01 : f32
    %192 = vector.broadcast %cst_67 : f32 to vector<16x1xf32>
    %193 = arith.divf %191, %192 : vector<16x1xf32>
    %cst_68 = arith.constant 9.99999997E-7 : f32
    %194 = vector.broadcast %cst_68 : f32 to vector<16x1xf32>
    %195 = arith.addf %193, %194 : vector<16x1xf32>
    %196 = math.rsqrt %195 : vector<16x1xf32>
    %197 = vector.broadcast %196 : vector<16x1xf32> to vector<16x32xf32>
    %198 = arith.mulf %187, %197 : vector<16x32xf32>
    %199 = vector.broadcast %188 : vector<1x32xf32> to vector<16x32xf32>
    %200 = arith.mulf %199, %198 : vector<16x32xf32>
    %201 = arith.truncf %200 : vector<16x32xf32> to vector<16x32xbf16>
    %c0_69 = arith.constant 0 : index
    %c0_70 = arith.constant 0 : index
    %202 = vector.load %arg5[%c0_69, %c0_70] : memref<32x64xbf16, #tpu.memory_space<vmem>>, vector<32x64xbf16>
    %cst_71 = arith.constant dense<0.000000e+00> : vector<16x64xf32>
    %203 = tpu.matmul %201, %202, %cst_71 {dimension_numbers = #tpu.dot_dimension_numbers<[1], [0], [0], [1], [0, 0, 1, 1], [], []>} : vector<16x32xbf16>, vector<32x64xbf16>, vector<16x64xf32> -> vector<16x64xf32>
    %c0_72 = arith.constant 0 : index
    %c0_73 = arith.constant 0 : index
    %204 = vector.load %arg6[%c0_72, %c0_73] : memref<32x64xbf16, #tpu.memory_space<vmem>>, vector<32x64xbf16>
    %cst_74 = arith.constant dense<0.000000e+00> : vector<16x64xf32>
    %205 = tpu.matmul %201, %204, %cst_74 {dimension_numbers = #tpu.dot_dimension_numbers<[1], [0], [0], [1], [0, 0, 1, 1], [], []>} : vector<16x32xbf16>, vector<32x64xbf16>, vector<16x64xf32> -> vector<16x64xf32>
    %206 = arith.negf %203 : vector<16x64xf32>
    %207 = math.exp %206 : vector<16x64xf32>
    %cst_75 = arith.constant 1.000000e+00 : f32
    %208 = vector.broadcast %cst_75 : f32 to vector<16x64xf32>
    %209 = arith.addf %208, %207 : vector<16x64xf32>
    %210 = arith.divf %208, %209 : vector<16x64xf32>
    %211 = arith.mulf %203, %210 : vector<16x64xf32>
    %212 = arith.mulf %211, %205 : vector<16x64xf32>
    %213 = arith.truncf %212 : vector<16x64xf32> to vector<16x64xbf16>
    %c0_76 = arith.constant 0 : index
    %c0_77 = arith.constant 0 : index
    %214 = vector.load %arg7[%c0_76, %c0_77] : memref<64x32xbf16, #tpu.memory_space<vmem>>, vector<64x32xbf16>
    %cst_78 = arith.constant dense<0.000000e+00> : vector<16x32xf32>
    %215 = tpu.matmul %213, %214, %cst_78 {dimension_numbers = #tpu.dot_dimension_numbers<[1], [0], [0], [1], [0, 0, 1, 1], [], []>} : vector<16x64xbf16>, vector<64x32xbf16>, vector<16x32xf32> -> vector<16x32xf32>
    %216 = arith.addf %187, %215 : vector<16x32xf32>
    %c0_79 = arith.constant 0 : index
    %c0_80 = arith.constant 0 : index
    %217 = vector.load %arg14[%c0_79, %c0_80] : memref<16x32xf32, #tpu.memory_space<vmem>>, vector<16x32xf32>
    tpu.vector_store %arg14[%c0_79, %c0_80], %216 {strides = array<i32>} : memref<16x32xf32, #tpu.memory_space<vmem>>, vector<16x32xf32>,
    return
  }
  func.func @transform_0(%arg0: i32) -> (i32, i32) {
    %c0_i32 = arith.constant 0 : i32
    %c0_i32_0 = arith.constant 0 : i32
    %c0_i32_1 = arith.constant 0 : i32
    return %c0_i32, %c0_i32_0 : i32, i32
  }
  func.func @transform_1(%arg0: i32) -> (i32, i32) {
    %c0_i32 = arith.constant 0 : i32
    %c0_i32_0 = arith.constant 0 : i32
    %c0_i32_1 = arith.constant 0 : i32
    return %c0_i32, %c0_i32_0 : i32, i32
  }
  func.func @transform_2(%arg0: i32) -> (i32, i32) {
    %c0_i32 = arith.constant 0 : i32
    %c0_i32_0 = arith.constant 0 : i32
    %c0_i32_1 = arith.constant 0 : i32
    return %c0_i32, %c0_i32_0 : i32, i32
  }
  func.func @transform_3(%arg0: i32) -> (i32, i32) {
    %c0_i32 = arith.constant 0 : i32
    %c0_i32_0 = arith.constant 0 : i32
    %c0_i32_1 = arith.constant 0 : i32
    return %c0_i32, %c0_i32_0 : i32, i32
  }
  func.func @transform_4(%arg0: i32) -> (i32, i32) {
    %c0_i32 = arith.constant 0 : i32
    %c0_i32_0 = arith.constant 0 : i32
    %c0_i32_1 = arith.constant 0 : i32
    return %c0_i32, %c0_i32_0 : i32, i32
  }
  func.func @transform_5(%arg0: i32) -> (i32, i32) {
    %c0_i32 = arith.constant 0 : i32
    %c0_i32_0 = arith.constant 0 : i32
    %c0_i32_1 = arith.constant 0 : i32
    return %c0_i32, %c0_i32_0 : i32, i32
  }
  func.func @transform_6(%arg0: i32) -> (i32, i32) {
    %c0_i32 = arith.constant 0 : i32
    %c0_i32_0 = arith.constant 0 : i32
    %c0_i32_1 = arith.constant 0 : i32
    return %c0_i32, %c0_i32_0 : i32, i32
  }
  func.func @transform_7(%arg0: i32) -> (i32, i32) {
    %c0_i32 = arith.constant 0 : i32
    %c0_i32_0 = arith.constant 0 : i32
    %c0_i32_1 = arith.constant 0 : i32
    return %c0_i32, %c0_i32_0 : i32, i32
  }
  func.func @transform_8(%arg0: i32) -> (i32, i32) {
    %c0_i32 = arith.constant 0 : i32
    %c0_i32_0 = arith.constant 0 : i32
    %c0_i32_1 = arith.constant 0 : i32
    return %c0_i32, %c0_i32_0 : i32, i32
  }
  func.func @transform_9(%arg0: i32) -> (i32, i32) {
    %c0_i32 = arith.constant 0 : i32
    %c0_i32_0 = arith.constant 0 : i32
    %c0_i32_1 = arith.constant 0 : i32
    return %c0_i32, %c0_i32_0 : i32, i32
  }
  func.func @transform_10(%arg0: i32) -> (i32, i32) {
    %c0_i32 = arith.constant 0 : i32
    %c0_i32_0 = arith.constant 0 : i32
    %c0_i32_1 = arith.constant 0 : i32
    return %c0_i32, %c0_i32_0 : i32, i32
  }
  func.func @transform_11(%arg0: i32) -> (i32, i32) {
    %c0_i32 = arith.constant 0 : i32
    %c0_i32_0 = arith.constant 0 : i32
    %c0_i32_1 = arith.constant 0 : i32
    return %c0_i32, %c0_i32_0 : i32, i32
  }
  func.func @transform_12(%arg0: i32) -> (i32, i32) {
    %c0_i32 = arith.constant 0 : i32
    %c0_i32_0 = arith.constant 0 : i32
    %c0_i32_1 = arith.constant 0 : i32
    return %c0_i32, %c0_i32_0 : i32, i32
  }
  func.func @transform_13(%arg0: i32) -> (i32, i32) {
    %c0_i32 = arith.constant 0 : i32
    %c0_i32_0 = arith.constant 0 : i32
    %c0_i32_1 = arith.constant 0 : i32
    return %c0_i32, %c0_i32_0 : i32, i32
  }
  func.func @transform_14(%arg0: i32) -> (i32, i32) {
    %c0_i32 = arith.constant 0 : i32
    %c0_i32_0 = arith.constant 0 : i32
    %c0_i32_1 = arith.constant 0 : i32
    return %c0_i32, %c0_i32_0 : i32, i32
  }
}

</mosaic_0001>

<bundles_post_ra>
// kernel: tpu_custom_call.1
= control target key start
LH: loop header
LB: loop body
LE: loop exit
PB: predicated region body
PF: predicated region fallthrough
CT: control target
= control target key end

     0   :  { %20 = vsyncpa [#allocation3], 0  ;;  %s2923_s0 = inlined_call_operand.hbm [shape: f32[16,32], index: 0, kind: input, shape index: {}]   ;;  %s2924_s1 = inlined_call_operand.hbm [shape: bf16[32,64], index: 1, kind: input, shape index: {}]   ;;  %s2925_s2 = inlined_call_operand.hbm [shape: bf16[32,24], index: 2, kind: input, shape index: {}]   ;;  %s2926_s3 = inlined_call_operand.hbm [shape: bf16[32,32], index: 3, kind: input, shape index: {}]   ;;  %s2927_s4 = inlined_call_operand.hbm [shape: bf16[32,64], index: 4, kind: input, shape index: {}]   ;;  %s2928_s5 = inlined_call_operand.hbm [shape: bf16[32,64], index: 5, kind: input, shape index: {}]   ;;  %s2929_s6 = inlined_call_operand.hbm [shape: bf16[64,32], index: 6, kind: input, shape index: {}]   ;;  %s2930_s7 = inlined_call_operand.hbm [shape: f32[1,32], index: 7, kind: input, shape index: {}]   ;;  %s2931_s8 = inlined_call_operand.hbm [shape: f32[1,32], index: 8, kind: input, shape index: {}]   ;;  %s2932_s9 = inlined_call_operand.hbm [shape: f32[16,32], index: 9, kind: input, shape index: {}]   ;;  %s2933_s10 = inlined_call_operand.hbm [shape: f32[16,32], index: 10, kind: input, shape index: {}]   ;;  %s2934_s11 = inlined_call_operand.hbm [shape: f32[16,8], index: 11, kind: input, shape index: {}]   ;;  %s2935_s12 = inlined_call_operand.hbm [shape: f32[16,8], index: 12, kind: input, shape index: {}]   ;;  %s2936_s13 = inlined_call_operand.hbm [shape: f32[16,32], index: 13, kind: output, shape index: {0}]   ;;  %s2937_s14 = inlined_call_operand.hbm [shape: f32[16,16], index: 14, kind: output, shape index: {1}]  }
   0x1   :  { %21 = vsyncpa [#allocation6], 0 }
   0x2   :  { %22 = vsyncpa [#allocation9], 0 }
   0x3   :  { %23 = vsyncpa [#allocation12], 0 }
   0x4   :  { %24 = vsyncpa [#allocation15], 0 }
   0x5   :  { %25 = vsyncpa [#allocation18], 0 }
   0x6   :  { %26 = vsyncpa [#allocation21], 0 }
   0x7   :  { %27 = vsyncpa [#allocation4], 0 }
   0x8   :  { %28 = vsyncpa [#allocation25], 0  ;;  %s2333_s29 = smov [#allocation5]   ;;  %s1985_s17 = scalar_lea.hbm %s2924_s1, 256 }
   0x9   :  { %s46_s30 = sshll.u32 %s2333_s29, 4  ;;  %p1986_p0 = scmp.ne.s32.totalorder %s2924_s1, %s1985_s17  ;;  %s47_s30 = int_to_ptr.vmem [resolvable:$true] %s46_s30 }
   0xa   :  { %p1989_p1 = scmp.lt.u32.totalorder %s1985_s17, %s2924_s1 }
   0xc   :  { %p1991_p2 = pnand %p1989_p1, %p1986_p0 }
   0xe   :  { %1994 = shalt.err (!%p1991_p2)
}
   0xf   :  { %s1995_s22 = scalar_lea.vmem %s47_s30, 256  ;;  %p2000_p4 = scmp.lt.s32.totalorder %s47_s30, %s47_s30 }
  0x10   :  { %p1996_p3 = scmp.ne.s32.totalorder %s47_s30, %s1995_s22  ;;  %p2001_p5 = scmp.lt.s32.totalorder %s1995_s22, %s1995_s22 }
  0x12   :  { %p2002_p6 = por %p2001_p5, %p2000_p4 }
  0x14   :  { %p2003_p7 = pnand %p2002_p6, %p1996_p3 }
  0x16   :  { %2006 = shalt.err (!%p2003_p7)
}
  0x17   :  { %s2334_s23 = smov 64   ;;  %s2335_s24 = smov 4  }
  0x18   :  { %52 = dma.hbm_to_vmem [thread:$0]  %s2924_s1, 256, %s47_s30, [#allocation6], %s2334_s23, %s2334_s23, %s2335_s24  }
  0x19   :  { %s2336_s27 = smov [#allocation8]   ;;  %s2337_s29 = smov [#allocation11]  }
  0x1a   :  { %s70_s28 = sshll.u32 %s2336_s27, 4  ;;  %s94_s15 = sshll.u32 %s2337_s29, 4  ;;  %s71_s28 = int_to_ptr.vmem [resolvable:$true] %s70_s28  ;;  %s95_s15 = int_to_ptr.vmem [resolvable:$true] %s94_s15 }
  0x1b   :  { %s2007_s18 = scalar_lea.hbm %s2926_s3, 256 }
  0x1c   :  { %p2008_p8 = scmp.ne.s32.totalorder %s2926_s3, %s2007_s18  ;;  %p2011_p9 = scmp.lt.u32.totalorder %s2007_s18, %s2926_s3 }
  0x1e   :  { %p2013_p10 = pnand %p2011_p9, %p2008_p8 }
  0x20   :  { %2016 = shalt.err (!%p2013_p10)
}
  0x21   :  { %s2017_s1 = scalar_lea.vmem %s71_s28, 256  ;;  %p2022_p12 = scmp.lt.s32.totalorder %s71_s28, %s71_s28 }
  0x22   :  { %p2018_p11 = scmp.ne.s32.totalorder %s71_s28, %s2017_s1  ;;  %p2023_p13 = scmp.lt.s32.totalorder %s2017_s1, %s2017_s1 }
  0x24   :  { %p2024_p0 = por %p2023_p13, %p2022_p12 }
  0x26   :  { %p2025_p1 = pnand %p2024_p0, %p2018_p11 }
  0x28   :  { %2028 = shalt.err (!%p2025_p1)
}
  0x29   :  { %76 = dma.hbm_to_vmem [thread:$0]  %s2926_s3, 256, %s71_s28, [#allocation9], %s2334_s23, %s2334_s23, %s2335_s24  }
  0x2a   :  { %s2029_s29 = scalar_lea.hbm %s2928_s5, 256 }
  0x2b   :  { %p2030_p2 = scmp.ne.s32.totalorder %s2928_s5, %s2029_s29  ;;  %p2033_p3 = scmp.lt.u32.totalorder %s2029_s29, %s2928_s5 }
  0x2d   :  { %p2035_p4 = pnand %p2033_p3, %p2030_p2 }
  0x2f   :  { %2038 = shalt.err (!%p2035_p4)
}
  0x30   :  { %s2039_s20 = scalar_lea.vmem %s95_s15, 256  ;;  %p2044_p6 = scmp.lt.s32.totalorder %s95_s15, %s95_s15 }
  0x31   :  { %p2040_p5 = scmp.ne.s32.totalorder %s95_s15, %s2039_s20  ;;  %p2045_p7 = scmp.lt.s32.totalorder %s2039_s20, %s2039_s20 }
  0x33   :  { %p2046_p8 = por %p2045_p7, %p2044_p6 }
  0x35   :  { %p2047_p9 = pnand %p2046_p8, %p2040_p5 }
  0x37   :  { %2050 = shalt.err (!%p2047_p9)
}
  0x38   :  { %100 = dma.hbm_to_vmem [thread:$0]  %s2928_s5, 256, %s95_s15, [#allocation12], %s2334_s23, %s2334_s23, %s2335_s24  }
  0x39   :  { %s2338_s21 = smov [#allocation14]   ;;  %s2051_s25 = scalar_lea.hbm %s2930_s7, 16 }
  0x3a   :  { %s119_s22 = sshll.u32 %s2338_s21, 4  ;;  %p2052_p10 = scmp.ne.s32.totalorder %s2930_s7, %s2051_s25  ;;  %s120_s22 = int_to_ptr.vmem [resolvable:$true] %s119_s22 }
  0x3b   :  { %p2055_p11 = scmp.lt.u32.totalorder %s2051_s25, %s2930_s7 }
  0x3d   :  { %p2057_p12 = pnand %p2055_p11, %p2052_p10 }
  0x3f   :  { %2060 = shalt.err (!%p2057_p12)
}
  0x40   :  { %s2061_s17 = scalar_lea.vmem %s120_s22, 16  ;;  %s2065_s5 = scalar_lea.vmem %s120_s22, 32 }
  0x41   :  { %p2062_p13 = scmp.ne.s32.totalorder %s120_s22, %s2061_s17  ;;  %p2066_p0 = scmp.lt.s32.totalorder %s120_s22, %s120_s22 }
  0x42   :  { %p2067_p1 = scmp.lt.s32.totalorder %s2065_s5, %s2061_s17 }
  0x44   :  { %p2068_p2 = por %p2067_p1, %p2066_p0 }
  0x46   :  { %p2069_p3 = pnand %p2068_p2, %p2062_p13 }
  0x48   :  { %2072 = shalt.err (!%p2069_p3)
}
  0x49   :  { %122 = dma.hbm_to_vmem [thread:$0]  %s2930_s7, 16, %s120_s22, [#allocation15]  }
  0x4a   :  { %s2339_s19 = smov [#allocation17]   ;;  %s2340_s3 = smov [#allocation20]  }
  0x4b   :  { %s138_s20 = sshll.u32 %s2339_s19, 4  ;;  %s162_s28 = sshll.u32 %s2340_s3, 4  ;;  %s139_s20 = int_to_ptr.vmem [resolvable:$true] %s138_s20  ;;  %s2493_s28 = int_to_ptr.vmem [resolvable:$true] %s162_s28 }
  0x4c   :  { %s2073_s30 = scalar_lea.hbm %s2932_s9, 256 }
  0x4d   :  { %p2074_p4 = scmp.ne.s32.totalorder %s2932_s9, %s2073_s30  ;;  %p2077_p5 = scmp.lt.u32.totalorder %s2073_s30, %s2932_s9 }
  0x4f   :  { %p2079_p6 = pnand %p2077_p5, %p2074_p4 }
  0x51   :  { %2082 = shalt.err (!%p2079_p6)
}
  0x52   :  { %s2083_s7 = scalar_lea.vmem %s139_s20, 256  ;;  %p2088_p8 = scmp.lt.s32.totalorder %s139_s20, %s139_s20 }
  0x53   :  { %p2084_p7 = scmp.ne.s32.totalorder %s139_s20, %s2083_s7  ;;  %p2089_p9 = scmp.lt.s32.totalorder %s2083_s7, %s2083_s7 }
  0x55   :  { %p2090_p10 = por %p2089_p9, %p2088_p8 }
  0x57   :  { %p2091_p11 = pnand %p2090_p10, %p2084_p7 }
  0x59   :  { %2094 = shalt.err (!%p2091_p11)
}
  0x5a   :  { %s2341_s22 = smov 128   ;;  %s2342_s16 = smov 8  }
  0x5b   :  { %144 = dma.hbm_to_vmem [thread:$0]  %s2932_s9, 256, %s139_s20, [#allocation18], %s2341_s22, %s2341_s22, %s2342_s16  }
  0x5c   :  { %s2095_s19 = scalar_lea.hbm %s2934_s11, 256 }
  0x5d   :  { %p2096_p12 = scmp.ne.s32.totalorder %s2934_s11, %s2095_s19  ;;  %p2099_p13 = scmp.lt.u32.totalorder %s2095_s19, %s2934_s11 }
  0x5f   :  { %p2101_p0 = pnand %p2099_p13, %p2096_p12 }
  0x61   :  { %2104 = shalt.err (!%p2101_p0)
}
  0x62   :  { %s2105_s25 = scalar_lea.vmem %s2493_s28, 256  ;;  %p2110_p2 = scmp.lt.s32.totalorder %s2493_s28, %s2493_s28 }
  0x63   :  { %p2106_p1 = scmp.ne.s32.totalorder %s2493_s28, %s2105_s25  ;;  %p2111_p3 = scmp.lt.s32.totalorder %s2105_s25, %s2105_s25 }
  0x65   :  { %p2112_p4 = por %p2111_p3, %p2110_p2 }
  0x67   :  { %p2113_p5 = pnand %p2112_p4, %p2106_p1 }
  0x69   :  { %2116 = shalt.err (!%p2113_p5)
}
  0x6a   :  { %168 = dma.hbm_to_vmem [thread:$0]  %s2934_s11, 256, %s2493_s28, [#allocation21], %s2341_s22, %s2341_s22, %s2342_s16  }
  0x6b   :  { %s2343_s26 = smov [#allocation2]   ;;  %s2344_s29 = smov [#allocation7]  }
  0x6c   :  { %s34_s27 = sshll.u32 %s2343_s26, 4  ;;  %s58_s7 = sshll.u32 %s2344_s29, 4  ;;  %s35_s27 = int_to_ptr.vmem [resolvable:$true] %s34_s27  ;;  %s2530_s7 = int_to_ptr.vmem [resolvable:$true] %s58_s7 }
  0x6d   :  { %s2117_s15 = scalar_lea.hbm %s2923_s0, 256 }
  0x6e   :  { %p2118_p6 = scmp.ne.s32.totalorder %s2923_s0, %s2117_s15  ;;  %p2121_p7 = scmp.lt.u32.totalorder %s2117_s15, %s2923_s0 }
  0x70   :  { %p2123_p8 = pnand %p2121_p7, %p2118_p6 }
  0x72   :  { %2126 = shalt.err (!%p2123_p8)
}
  0x73   :  { %s2127_s11 = scalar_lea.vmem %s35_s27, 256  ;;  %p2132_p10 = scmp.lt.s32.totalorder %s35_s27, %s35_s27 }
  0x74   :  { %p2128_p9 = scmp.ne.s32.totalorder %s35_s27, %s2127_s11  ;;  %p2133_p11 = scmp.lt.s32.totalorder %s2127_s11, %s2127_s11 }
  0x76   :  { %p2134_p12 = por %p2133_p11, %p2132_p10 }
  0x78   :  { %p2135_p13 = pnand %p2134_p12, %p2128_p9 }
  0x7a   :  { %2138 = shalt.err (!%p2135_p13)
}
  0x7b   :  { %40 = dma.hbm_to_vmem [thread:$0]  %s2923_s0, 256, %s35_s27, [#allocation3], %s2341_s22, %s2341_s22, %s2342_s16  }
  0x7c   :  { %s2139_s9 = scalar_lea.hbm %s2925_s2, 256 }
  0x7d   :  { %p2140_p0 = scmp.ne.s32.totalorder %s2925_s2, %s2139_s9  ;;  %p2143_p1 = scmp.lt.u32.totalorder %s2139_s9, %s2925_s2 }
  0x7f   :  { %p2145_p2 = pnand %p2143_p1, %p2140_p0 }
  0x81   :  { %2148 = shalt.err (!%p2145_p2)
}
  0x82   :  { %s2149_s5 = scalar_lea.vmem %s2530_s7, 256  ;;  %p2154_p4 = scmp.lt.s32.totalorder %s2530_s7, %s2530_s7 }
  0x83   :  { %p2150_p3 = scmp.ne.s32.totalorder %s2530_s7, %s2149_s5  ;;  %p2155_p5 = scmp.lt.s32.totalorder %s2149_s5, %s2149_s5 }
  0x85   :  { %p2156_p6 = por %p2155_p5, %p2154_p4 }
  0x87   :  { %p2157_p7 = pnand %p2156_p6, %p2150_p3 }
  0x89   :  { %2160 = shalt.err (!%p2157_p7)
}
  0x8a   :  { %64 = dma.hbm_to_vmem [thread:$0]  %s2925_s2, 256, %s2530_s7, [#allocation6], %s2334_s23, %s2334_s23, %s2335_s24  }
  0x8b   :  { %s2345_s15 = smov [#allocation10]   ;;  %s2346_s19 = smov [#allocation13]  }
  0x8c   :  { %s82_s18 = sshll.u32 %s2345_s15, 4  ;;  %s106_s3 = sshll.u32 %s2346_s19, 4  ;;  %s83_s18 = int_to_ptr.vmem [resolvable:$true] %s82_s18  ;;  %s2567_s3 = int_to_ptr.vmem [resolvable:$true] %s106_s3 }
  0x8d   :  { %s2161_s28 = scalar_lea.hbm %s2927_s4, 256 }
  0x8e   :  { %p2162_p8 = scmp.ne.s32.totalorder %s2927_s4, %s2161_s28  ;;  %p2165_p9 = scmp.lt.u32.totalorder %s2161_s28, %s2927_s4 }
  0x90   :  { %p2167_p10 = pnand %p2165_p9, %p2162_p8 }
  0x92   :  { %2170 = shalt.err (!%p2167_p10)
}
  0x93   :  { %s2171_s2 = scalar_lea.vmem %s83_s18, 256  ;;  %p2176_p12 = scmp.lt.s32.totalorder %s83_s18, %s83_s18 }
  0x94   :  { %p2172_p11 = scmp.ne.s32.totalorder %s83_s18, %s2171_s2  ;;  %p2177_p13 = scmp.lt.s32.totalorder %s2171_s2, %s2171_s2 }
  0x96   :  { %p2178_p0 = por %p2177_p13, %p2176_p12 }
  0x98   :  { %p2179_p1 = pnand %p2178_p0, %p2172_p11 }
  0x9a   :  { %2182 = shalt.err (!%p2179_p1)
}
  0x9b   :  { %88 = dma.hbm_to_vmem [thread:$0]  %s2927_s4, 256, %s83_s18, [#allocation9], %s2334_s23, %s2334_s23, %s2335_s24  }
  0x9c   :  { %s2183_s17 = scalar_lea.hbm %s2929_s6, 512 }
  0x9d   :  { %p2184_p2 = scmp.ne.s32.totalorder %s2929_s6, %s2183_s17  ;;  %p2187_p3 = scmp.lt.u32.totalorder %s2183_s17, %s2929_s6 }
  0x9f   :  { %p2189_p4 = pnand %p2187_p3, %p2184_p2 }
  0xa1   :  { %2192 = shalt.err (!%p2189_p4)
}
  0xa2   :  { %s2193_s19 = scalar_lea.vmem %s2567_s3, 512  ;;  %p2198_p6 = scmp.lt.s32.totalorder %s2567_s3, %s2567_s3 }
  0xa3   :  { %p2194_p5 = scmp.ne.s32.totalorder %s2567_s3, %s2193_s19  ;;  %p2199_p7 = scmp.lt.s32.totalorder %s2193_s19, %s2193_s19 }
  0xa5   :  { %p2200_p8 = por %p2199_p7, %p2198_p6 }
  0xa7   :  { %p2201_p9 = pnand %p2200_p8, %p2194_p5 }
  0xa9   :  { %2204 = shalt.err (!%p2201_p9)
}
  0xaa   :  { %112 = dma.hbm_to_vmem [thread:$0]  %s2929_s6, 512, %s2567_s3, [#allocation12], %s2334_s23, %s2334_s23, %s2335_s24  }
  0xab   :  { %s2347_s21 = smov [#allocation16]   ;;  %s2348_s28 = smov [#allocation19]  }
  0xac   :  { %s129_s11 = sshll.u32 %s2347_s21, 4  ;;  %s150_s1 = sshll.u32 %s2348_s28, 4  ;;  %s130_s11 = int_to_ptr.vmem [resolvable:$true] %s129_s11  ;;  %s2604_s1 = int_to_ptr.vmem [resolvable:$true] %s150_s1 }
  0xad   :  { %s2205_s9 = scalar_lea.hbm %s2931_s8, 16 }
  0xae   :  { %p2206_p10 = scmp.ne.s32.totalorder %s2931_s8, %s2205_s9  ;;  %p2209_p11 = scmp.lt.u32.totalorder %s2205_s9, %s2931_s8 }
  0xb0   :  { %p2211_p12 = pnand %p2209_p11, %p2206_p10 }
  0xb2   :  { %2214 = shalt.err (!%p2211_p12)
}
  0xb3   :  { %s2215_s6 = scalar_lea.vmem %s130_s11, 16  ;;  %s2219_s23 = scalar_lea.vmem %s130_s11, 32 }
  0xb4   :  { %p2216_p13 = scmp.ne.s32.totalorder %s130_s11, %s2215_s6  ;;  %p2220_p0 = scmp.lt.s32.totalorder %s130_s11, %s130_s11 }
  0xb5   :  { %p2221_p1 = scmp.lt.s32.totalorder %s2219_s23, %s2215_s6 }
  0xb7   :  { %p2222_p2 = por %p2221_p1, %p2220_p0 }
  0xb9   :  { %p2223_p3 = pnand %p2222_p2, %p2216_p13 }
  0xbb   :  { %2226 = shalt.err (!%p2223_p3)
}
  0xbc   :  { %132 = dma.hbm_to_vmem [thread:$0]  %s2931_s8, 16, %s130_s11, [#allocation15]  }
  0xbd   :  { %s2227_s5 = scalar_lea.hbm %s2933_s10, 256 }
  0xbe   :  { %p2228_p4 = scmp.ne.s32.totalorder %s2933_s10, %s2227_s5  ;;  %p2231_p5 = scmp.lt.u32.totalorder %s2227_s5, %s2933_s10 }
  0xc0   :  { %p2233_p6 = pnand %p2231_p5, %p2228_p4 }
  0xc2   :  { %2236 = shalt.err (!%p2233_p6)
}
  0xc3   :  { %s2237_s4 = scalar_lea.vmem %s2604_s1, 256  ;;  %p2242_p8 = scmp.lt.s32.totalorder %s2604_s1, %s2604_s1 }
  0xc4   :  { %p2238_p7 = scmp.ne.s32.totalorder %s2604_s1, %s2237_s4  ;;  %p2243_p9 = scmp.lt.s32.totalorder %s2237_s4, %s2237_s4 }
  0xc6   :  { %p2244_p10 = por %p2243_p9, %p2242_p8 }
  0xc8   :  { %p2245_p11 = pnand %p2244_p10, %p2238_p7 }
  0xca   :  { %2248 = shalt.err (!%p2245_p11)
}
  0xcb   :  { %156 = dma.hbm_to_vmem [thread:$0]  %s2933_s10, 256, %s2604_s1, [#allocation18], %s2341_s22, %s2341_s22, %s2342_s16  }
  0xcc   :  { %s2349_s21 = smov [#allocation22]   ;;  %s2249_s25 = scalar_lea.hbm %s2935_s12, 256 }
  0xcd   :  { %s174_s11 = sshll.u32 %s2349_s21, 4  ;;  %p2250_p12 = scmp.ne.s32.totalorder %s2935_s12, %s2249_s25  ;;  %s175_s11 = int_to_ptr.vmem [resolvable:$true] %s174_s11 }
  0xce   :  { %p2253_p13 = scmp.lt.u32.totalorder %s2249_s25, %s2935_s12 }
  0xd0   :  { %p2255_p0 = pnand %p2253_p13, %p2250_p12 }
  0xd2   :  { %2258 = shalt.err (!%p2255_p0)
}
  0xd3   :  { %s2259_s26 = scalar_lea.vmem %s175_s11, 256  ;;  %p2264_p2 = scmp.lt.s32.totalorder %s175_s11, %s175_s11 }
  0xd4   :  { %p2260_p1 = scmp.ne.s32.totalorder %s175_s11, %s2259_s26  ;;  %p2265_p3 = scmp.lt.s32.totalorder %s2259_s26, %s2259_s26 }
  0xd6   :  { %p2266_p4 = por %p2265_p3, %p2264_p2 }
  0xd8   :  { %p2267_p5 = pnand %p2266_p4, %p2260_p1 }
  0xda   :  { %2270 = shalt.err (!%p2267_p5)
}
  0xdb   :  { %180 = dma.hbm_to_vmem [thread:$0]  %s2935_s12, 256, %s175_s11, [#allocation21], %s2341_s22, %s2341_s22, %s2342_s16  }
  0xdc   :  { %2315 = dma.done.wait [#allocation3], 256  }
  0xdd   :  { %2316 = vsyncadd [#allocation3], 4294967040 }
  0xde   :  { %2317 = dma.done.wait [#allocation6], 512  }
  0xdf   :  { %2318 = vsyncadd [#allocation6], 4294966784 }
  0xe0   :  { %2319 = dma.done.wait [#allocation9], 512  }
  0xe1   :  { %2320 = vsyncadd [#allocation9], 4294966784 }
  0xe2   :  { %2321 = dma.done.wait [#allocation12], 768  }
  0xe3   :  { %2322 = vsyncadd [#allocation12], 4294966528 }
  0xe4   :  { %2323 = dma.done.wait [#allocation15], 32  }
  0xe5   :  { %2324 = vsyncadd [#allocation15], 4294967264 }
  0xe6   :  { %2325 = dma.done.wait [#allocation18], 512  }
  0xe7   :  { %2326 = vsyncadd [#allocation18], 4294966784 }
  0xe8   :  { %2327 = dma.done.wait [#allocation21], 512  }
  0xe9   :  { %2328 = vsyncadd [#allocation21], 4294966784  ;;  %v2653_v0 = vld [vmem:[#allocation2] sm:$0xff]  ;;  %vm226_vm0 = vcmask 261120   ;;  %v2655_v1 = vld [vmem:[#allocation2 + $0x8] sm:$0xff]  ;;  %v2350_v8 = vmov 0.0  }
  0xea   :  { %v224_v2 = vmul.f32 %v2653_v0, %v2653_v0  ;;  %v225_v3 = vmul.f32 %v2655_v1, %v2655_v1  ;;  %v1923_v6 = vld [vmem:[#allocation5] sm:$0xff]   ;;  %v1924_v7 = vld [vmem:[#allocation7] sm:$0xff]   ;;  %1747 = vmatprep.subr.bf16.mxu0 %v2350_v8  ;;  %1755 = vmatprep.subr.bf16.mxu1 %v2350_v8  ;;  %v1925_v9 = vld [vmem:[#allocation5 + $0x8] sm:$0xff]   ;;  %vm2351_vm1 = vmmov 0   ;;  %s2352_s12 = smov 32   ;;  %s2353_s6 = smov 96  }
  0xeb   :  { %1748 = vmatpush3.bf16.msra.mxu0 %v1923_v6  ;;  %1756 = vmatpush3.bf16.msra.mxu1 %v1924_v7  ;;  %v1926_v10 = vld [vmem:[#allocation7 + $0x8] sm:$0xff]   ;;  %v315_v11 = vld [vmem:[#allocation19] sm:$0xff]  ;;  %v316_v13 = vld [vmem:[#allocation19 + $0x8] sm:$0xff]  ;;  %s2354_s23 = smov 120   ;;  %s2355_s24 = smov 112   ;;  %vm428_vm2 = vcmask 64512  }
  0xec   :  { %v227_v4 = vsel %vm226_vm0, %v224_v2, 0.0  ;;  %v230_v5 = vsel %vm226_vm0, %v225_v3, 0.0  ;;  %1749 = vmatprep.subr.bf16.mxu0 %v2350_v8  ;;  %1757 = vmatprep.subr.bf16.mxu1 %v2350_v8  ;;  %v398_v12 = vld [vmem:[#allocation22] sm:$0xff]  ;;  %v399_v14 = vld [vmem:[#allocation22 + $0x8] sm:$0xff]  ;;  %v311_v46 = vld [vmem:[#allocation17] sm:$0xff]  ;;  %s2356_s3 = smov 104  }
  0xed   :  { %228 = vadd.xlane.f32.xlu0 %v227_v4  ;;  %1751 = vmatprep.mubr.msk.bf16.mxu0 %vm2351_vm1, %v2350_v8  ;;  %v1655_v24 = vld [vmem:[#allocation14] ss:$0 sm:$0xff]  ;;  %v312_v47 = vld [vmem:[#allocation17 + $0x8] sm:$0xff]  ;;  %v394_v55 = vld [vmem:[#allocation20] sm:$0xff]  ;;  %vm505_vm4 = vcmask 1043456   ;;  %s2357_s29 = smov 16  }
  0xee   :  { %1759 = vmatprep.mubr.msk.bf16.mxu1 %vm2351_vm1, %v2350_v8  ;;  %319 = vrot.lane.b32.xlu1 %v315_v11, %s2352_s12  ;;  %v395_v57 = vld [vmem:[#allocation20 + $0x8] sm:$0xff]  ;;  %s2358_s17 = smov 24   ;;  %vm431_vm5 = vcmask 130048   ;;  %vm873_vm6 = vcmask 195584   ;;  %vm1567_vm7 = vcmask 523264   ;;  %s2359_s5 = smov [#allocation24]  }
  0xef   :  { %1750 = vmatpush3.bf16.msra.mxu0 %v1925_v9  ;;  %1758 = vmatpush3.bf16.msra.mxu1 %v1926_v10  ;;  %s1633_s0 = sshll.u32 %s2359_s5, 4  ;;  %s1634_s0 = int_to_ptr.vmem [resolvable:$true] %s1633_s0 }
  0xf0   :  { %1763 = vmatprep.subr.bf16.mxu0 %v2350_v8  ;;  %1769 = vmatprep.subr.bf16.mxu1 %v2350_v8  ;;  %s2271_s27 = scalar_lea.vmem %s1634_s0, 256  ;;  %p2276_p7 = scmp.lt.s32.totalorder %s1634_s0, %s1634_s0 }
  0xf1   :  { %231 = vadd.xlane.f32.xlu0 %v230_v5  ;;  %p2272_p6 = scmp.ne.s32.totalorder %s1634_s0, %s2271_s27  ;;  %p2277_p8 = scmp.lt.s32.totalorder %s2271_s27, %s2271_s27 }
  0xf2   :  { %321 = vrot.lane.b32.xlu1 %v316_v13, %s2352_s12  ;;  %v434_v13 = vlaneseq }
  0xf3   :  { %p2278_p9 = por %p2277_p8, %p2276_p7 }
  0xf5   :  { %p2279_p10 = pnand %p2278_p9, %p2272_p6 }
  0xf6   :  { %404 = vrot.lane.b32.xlu1 %v399_v14, %s2342_s16  ;;  %v435_v14 = vshrl.u32 %v434_v13, 7 }
 0x107   :  { %402 = vrot.lane.b32.xlu0 %v398_v12, %s2342_s16 }
 0x160   :  { %v320_v29 = vpop.permute.xlu1 %319 }
 0x164   :  { %v322_v39 = vpop.permute.xlu1 %321 }
 0x168   :  { %v405_v44 = vpop.permute.xlu1 %404 }
 0x17a   :  { %v229_v15 = vpop.xlane.xlu0 %228 }
 0x17b   :  { %v234_v16 = vmul.f32 0.03125, %v229_v15  ;;  %v437_v15 = vand.u32 127, %v434_v13 }
 0x17d   :  { %v236_v17 = vadd.f32 1e-06, %v234_v16  ;;  %vm2741_vm3 = vcmp.le.s32.totalorder %v437_v15, %v435_v14 }
 0x17e   :  { %v232_v18 = vpop.xlane.xlu0 %231 }
 0x17f   :  { %1937 = vrsqrt.f32 %v236_v17  ;;  %v235_v19 = vmul.f32 0.03125, %v232_v18 }
 0x181   :  { %v237_v20 = vadd.f32 1e-06, %v235_v19 }
 0x182   :  { %v403_v42 = vpop.permute.xlu0 %402 }
 0x183   :  { %1939 = vrsqrt.f32 %v237_v20 }
 0x189   :  { %v1938_v21 = vpop.eup %1937 }
 0x18a   :  { %v240_v22 = vmul.f32 %v1938_v21, %v2653_v0 }
 0x18c   :  { %v248_v26 = vmul.f32 %v1655_v24, %v240_v22 }
 0x18d   :  { %v1940_v23 = vpop.eup %1939 }
 0x18e   :  { %v241_v25 = vmul.f32 %v1940_v23, %v2655_v1 }
 0x190   :  { %v249_v27 = vmul.f32 %v1655_v24, %v241_v25 }
 0x192   :  { %v250_v28 = vpack.c.bf16 %v249_v27, %v248_v26 }
 0x194   :  { %1752 = vmatmul.mubr.msk.bf16.vlgmr.msra.gmra.mrb[0].mxu0 %vm226_vm0, %v250_v28  ;;  %1760 = vmatmul.mubr.msk.bf16.vlgmr.msra.gmra.mrb[0].mxu1 %vm226_vm0, %v250_v28 }
 0x195   :  { %1765 = vmatprep.mubr.msk.bf16.mxu0 %vm2351_vm1, %v2350_v8  ;;  %1771 = vmatprep.mubr.msk.bf16.mxu1 %vm2351_vm1, %v2350_v8 }
 0x267   :  { %v304_v30 = vpop.f32.mrb[0].mxu0  ;;  %v2683_v31 = vpop.f32.mrb[0].mxu1 }
 0x268   :  { %v325_v32 = vmul.f32 %v320_v29, %v304_v30  ;;  %v1753_v33 = vpop.f32.mrb[1].mxu0  ;;  %v1761_v34 = vpop.f32.mrb[1].mxu1  ;;  %v408_v43 = vmul.f32 %v403_v42, %v2683_v31  ;;  %v313_v49 = vmul.f32 %v311_v46, %v304_v30  ;;  %v396_v58 = vmul.f32 %v394_v55, %v2683_v31 }
 0x269   :  { %v307_v35 = vpop.f32.mrb[2].mxu0  ;;  %v2685_v36 = vpop.f32.mrb[2].mxu1 }
 0x26a   :  { %v1762_v37 = vpop.f32.mrb[3].mxu1  ;;  %329 = vrot.lane.b32.xlu1 %v325_v32, %s2353_s6  ;;  %v1754_v38 = vpop.f32.mrb[3].mxu0  ;;  %v2689_v40 = vpack.c.bf16 %v2685_v36, %v2683_v31  ;;  %v326_v41 = vmul.f32 %v322_v39, %v307_v35  ;;  %v409_v45 = vmul.f32 %v405_v44, %v2685_v36  ;;  %v314_v50 = vmul.f32 %v312_v47, %v307_v35 }
 0x26b   :  { %v397_v59 = vmul.f32 %v395_v57, %v2685_v36 }
 0x26e   :  { %331 = vrot.lane.b32.xlu1 %v326_v41, %s2353_s6 }
 0x272   :  { %412 = vrot.lane.b32.xlu1 %v408_v43, %s2354_s23 }
 0x276   :  { %414 = vrot.lane.b32.xlu1 %v409_v45, %s2354_s23 }
 0x2dc   :  { %v330_v48 = vpop.permute.xlu1 %329 }
 0x2dd   :  { %v335_v52 = vadd.f32 %v330_v48, %v313_v49 }
 0x2e0   :  { %v332_v51 = vpop.permute.xlu1 %331 }
 0x2e1   :  { %v336_v53 = vadd.f32 %v332_v51, %v314_v50 }
 0x2e3   :  { %v439_v54 = vpack.c.bf16 %v336_v53, %v335_v52 }
 0x2e4   :  { %v413_v56 = vpop.permute.xlu1 %412 }
 0x2e5   :  { %655 = vrot.lane.b32.xlu0 %v439_v54, %s2355_s24  ;;  %553 = vrot.lane.b32.xlu1 %v439_v54, %s2354_s23  ;;  %v876_v60 = vrot.slane %v439_v54, 4  ;;  %v2699_v62 = vadd.f32 %v413_v56, %v396_v58 }
 0x2e8   :  { %v415_v61 = vpop.permute.xlu1 %414 }
 0x2e9   :  { %v2701_v63 = vadd.f32 %v415_v61, %v397_v59  ;;  %988 = vrot.lane.b32.xlu0 %v876_v60, %s2354_s23  ;;  %757 = vrot.lane.b32.xlu1 %v439_v54, %s2356_s3 }
 0x2eb   :  { %v440_v2 = vpack.c.bf16 %v2701_v63, %v2699_v62 }
 0x2ed   :  { %1192 = vrot.lane.b32.xlu0 %v876_v60, %s2356_s3  ;;  %1090 = vrot.lane.b32.xlu1 %v876_v60, %s2355_s24  ;;  %v446_v3 = vsel %vm428_vm2, %v440_v2, 0  ;;  %v878_v6 = vrot.slane %v440_v2, 4 }
 0x2ee   :  { %1764 = vmatpush3.bf16.xpose.msra.mxu0 %v446_v3 }
 0x2ef   :  { %1775 = vmatprep.subr.bf16.mxu0 %v2350_v8  ;;  %v883_v9 = vsel %vm428_vm2, %v878_v6, 0 }
 0x2f5   :  { %1766 = vmatmul.mubr.msk.bf16.vlgmr.msra.gmra.mrb[4].mxu0 %vm428_vm2, %v439_v54 }
 0x2f6   :  { %1776 = vmatpush3.bf16.xpose.msra.mxu0 %v446_v3  ;;  %1777 = vmatprep.mubr.msk.bf16.mxu0 %vm2351_vm1, %v2350_v8 }
 0x2f7   :  { %1787 = vmatprep.subr.bf16.mxu0 %v2350_v8 }
 0x357   :  { %v554_v4 = vpop.permute.xlu1 %553  ;;  %v656_v5 = vpop.permute.xlu0 %655 }
 0x358   :  { %1778 = vmatmul.mubr.msk.bf16.vlgmr.msra.gmra.mrb[8].mxu0 %vm428_vm2, %v554_v4 }
 0x359   :  { %1788 = vmatpush3.bf16.xpose.msra.mxu0 %v446_v3  ;;  %1789 = vmatprep.mubr.msk.bf16.mxu0 %vm2351_vm1, %v2350_v8 }
 0x35a   :  { %1799 = vmatprep.subr.bf16.mxu0 %v2350_v8 }
 0x35b   :  { %v758_v7 = vpop.permute.xlu1 %757  ;;  %v989_v10 = vpop.permute.xlu0 %988 }
 0x35f   :  { %v1091_v11 = vpop.permute.xlu1 %1090  ;;  %v1193_v12 = vpop.permute.xlu0 %1192 }
 0x360   :  { %1790 = vmatmul.mubr.msk.bf16.vlgmr.msra.gmra.mrb[12].mxu0 %vm428_vm2, %v656_v5 }
 0x361   :  { %1800 = vmatpush3.bf16.xpose.msra.mxu0 %v446_v3  ;;  %1801 = vmatprep.mubr.msk.bf16.mxu0 %vm2351_vm1, %v2350_v8 }
 0x362   :  { %1811 = vmatprep.subr.bf16.mxu0 %v2350_v8 }
 0x368   :  { %1802 = vmatmul.mubr.msk.bf16.vlgmr.msra.gmra.mrb[16].mxu0 %vm428_vm2, %v758_v7 }
 0x369   :  { %1812 = vmatpush3.bf16.xpose.msra.mxu0 %v883_v9  ;;  %1813 = vmatprep.mubr.msk.bf16.mxu0 %vm2351_vm1, %v2350_v8 }
 0x36a   :  { %1823 = vmatprep.subr.bf16.mxu0 %v2350_v8 }
 0x370   :  { %1814 = vmatmul.mubr.msk.bf16.vlgmr.msra.gmra.mrb[20].mxu0 %vm428_vm2, %v876_v60 }
 0x371   :  { %1824 = vmatpush3.bf16.xpose.msra.mxu0 %v883_v9  ;;  %1825 = vmatprep.mubr.msk.bf16.mxu0 %vm2351_vm1, %v2350_v8 }
 0x372   :  { %1835 = vmatprep.subr.bf16.mxu0 %v2350_v8 }
 0x378   :  { %1826 = vmatmul.mubr.msk.bf16.vlgmr.msra.gmra.mrb[24].mxu0 %vm428_vm2, %v989_v10 }
 0x379   :  { %1836 = vmatpush3.bf16.xpose.msra.mxu0 %v883_v9  ;;  %1837 = vmatprep.mubr.msk.bf16.mxu0 %vm2351_vm1, %v2350_v8 }
 0x37a   :  { %1847 = vmatprep.subr.bf16.mxu0 %v2350_v8 }
 0x380   :  { %1838 = vmatmul.mubr.msk.bf16.vlgmr.msra.gmra.mrb[28].mxu0 %vm428_vm2, %v1091_v11 }
 0x381   :  { %1848 = vmatpush3.bf16.xpose.msra.mxu0 %v883_v9  ;;  %1849 = vmatprep.mubr.msk.bf16.mxu0 %vm2351_vm1, %v2350_v8  ;;  %v936_v9 = vrot.slane %v2689_v40, 4 }
 0x382   :  { %1859 = vmatprep.subr.bf16.mxu0 %v2350_v8 }
 0x388   :  { %1850 = vmatmul.mubr.msk.bf16.vlgmr.msra.gmra.mrb[32].mxu0 %vm428_vm2, %v1193_v12 }
 0x389   :  { %1863 = vmatprep.mubr.msk.bf16.mxu0 %vm2351_vm1, %v2350_v8 }
 0x3c8   :  { %v482_v17 = vpop.f32.mrb[4].mxu0 }
 0x3c9   :  { %v488_v18 = vsel %vm2741_vm3, %v482_v17, -1e+30  ;;  %v1767_v19 = vpop.f32.mrb[5].mxu0 }
 0x3ca   :  { %v485_v20 = vpop.f32.mrb[6].mxu0  ;;  %v489_v21 = vsel %vm428_vm2, %v488_v18, -inf }
 0x3cb   :  { %490 = vmax.xlane.f32.xlu1 %v489_v21  ;;  %v1768_v22 = vpop.f32.mrb[7].mxu0 }
 0x42b   :  { %v592_v23 = vpop.f32.mrb[8].mxu0 }
 0x42c   :  { %v598_v24 = vsel %vm2741_vm3, %v592_v23, -1e+30  ;;  %v1779_v25 = vpop.f32.mrb[9].mxu0 }
 0x42d   :  { %v595_v26 = vpop.f32.mrb[10].mxu0  ;;  %v599_v27 = vsel %vm428_vm2, %v598_v24, -inf }
 0x42e   :  { %600 = vmax.xlane.f32.xlu0 %v599_v27  ;;  %v1780_v28 = vpop.f32.mrb[11].mxu0 }
 0x433   :  { %v694_v29 = vpop.f32.mrb[12].mxu0 }
 0x434   :  { %v700_v30 = vsel %vm2741_vm3, %v694_v29, -1e+30  ;;  %v1791_v32 = vpop.f32.mrb[13].mxu0 }
 0x435   :  { %v697_v33 = vpop.f32.mrb[14].mxu0  ;;  %v701_v34 = vsel %vm428_vm2, %v700_v30, -inf }
 0x436   :  { %702 = vmax.xlane.f32.xlu0 %v701_v34  ;;  %v1792_v35 = vpop.f32.mrb[15].mxu0 }
 0x43b   :  { %v796_v37 = vpop.f32.mrb[16].mxu0 }
 0x43c   :  { %v2756_v38 = vsel %vm2741_vm3, %v796_v37, -1e+30  ;;  %v1803_v39 = vpop.f32.mrb[17].mxu0 }
 0x43d   :  { %v799_v41 = vpop.f32.mrb[18].mxu0  ;;  %v803_v42 = vsel %vm428_vm2, %v2756_v38, -inf }
 0x43e   :  { %804 = vmax.xlane.f32.xlu1 %v803_v42  ;;  %v1804_v43 = vpop.f32.mrb[19].mxu0 }
 0x443   :  { %v919_v44 = vpop.f32.mrb[20].mxu0 }
 0x444   :  { %v2762_v45 = vsel %vm2741_vm3, %v919_v44, -1e+30  ;;  %v1815_v46 = vpop.f32.mrb[21].mxu0 }
 0x445   :  { %v922_v47 = vpop.f32.mrb[22].mxu0  ;;  %v926_v48 = vsel %vm428_vm2, %v2762_v45, -inf }
 0x446   :  { %927 = vmax.xlane.f32.xlu1 %v926_v48  ;;  %v1816_v49 = vpop.f32.mrb[23].mxu0 }
 0x44b   :  { %v1027_v50 = vpop.f32.mrb[24].mxu0 }
 0x44c   :  { %v2768_v51 = vsel %vm2741_vm3, %v1027_v50, -1e+30  ;;  %500 = vrot.lane.b32.xlu0 %v2689_v40, %s2355_s24  ;;  %v1827_v52 = vpop.f32.mrb[25].mxu0 }
 0x44d   :  { %v1030_v53 = vpop.f32.mrb[26].mxu0  ;;  %v1034_v54 = vsel %vm428_vm2, %v2768_v51, -inf }
 0x44e   :  { %1035 = vmax.xlane.f32.xlu1 %v1034_v54  ;;  %v1828_v55 = vpop.f32.mrb[27].mxu0 }
 0x453   :  { %v1129_v56 = vpop.f32.mrb[28].mxu0 }
 0x454   :  { %v2776_v57 = vsel %vm2741_vm3, %v1129_v56, -1e+30  ;;  %v1839_v58 = vpop.f32.mrb[29].mxu0 }
 0x455   :  { %v1132_v59 = vpop.f32.mrb[30].mxu0  ;;  %v1136_v60 = vsel %vm428_vm2, %v2776_v57, -inf }
 0x456   :  { %1137 = vmax.xlane.f32.xlu1 %v1136_v60  ;;  %v1840_v61 = vpop.f32.mrb[31].mxu0 }
 0x458   :  { %v491_v10 = vpop.xlane.xlu1 %490 }
 0x459   :  { %v492_v11 = vsub.f32 %v488_v18, %v491_v10 }
 0x45b   :  { %v1231_v2 = vpop.f32.mrb[32].mxu0  ;;  %v493_v12 = vmul.f32 1.442695, %v492_v11 }
 0x45c   :  { %v2782_v3 = vsel %vm2741_vm3, %v1231_v2, -1e+30  ;;  %v1851_v4 = vpop.f32.mrb[33].mxu0 }
 0x45d   :  { %v1234_v5 = vpop.f32.mrb[34].mxu0  ;;  %v1238_v6 = vsel %vm428_vm2, %v2782_v3, -inf  ;;  %1941 = vpow2.f32 %v493_v12 }
 0x45e   :  { %1239 = vmax.xlane.f32.xlu1 %v1238_v6  ;;  %v1852_v7 = vpop.f32.mrb[35].mxu0 }
 0x467   :  { %v2788_v19 = vpop.eup %1941 }
 0x468   :  { %v498_v40 = vpack.c.bf16 %v2788_v19, %v2788_v19  ;;  %v495_v56 = vsel %vm428_vm2, %v2788_v19, 0.0 }
 0x46f   :  { %937 = vrot.lane.b32.xlu1 %v936_v9, %s2355_s24 }
 0x4bb   :  { %v601_v13 = vpop.xlane.xlu0 %600 }
 0x4bc   :  { %v602_v14 = vsub.f32 %v598_v24, %v601_v13 }
 0x4be   :  { %v603_v15 = vmul.f32 1.442695, %v602_v14 }
 0x4c0   :  { %1943 = vpow2.f32 %v603_v15 }
 0x4c3   :  { %v703_v16 = vpop.xlane.xlu0 %702 }
 0x4c4   :  { %v704_v17 = vsub.f32 %v700_v30, %v703_v16 }
 0x4c6   :  { %v705_v22 = vmul.f32 1.442695, %v704_v17 }
 0x4c7   :  { %v501_v20 = vpop.permute.xlu0 %500 }
 0x4c8   :  { %v507_v21 = vsel %vm505_vm4, %v501_v20, 0  ;;  %1945 = vpow2.f32 %v705_v22 }
 0x4c9   :  { %1770 = vmatpush3.bf16.msra.mxu1 %v507_v21 }
 0x4ca   :  { %1781 = vmatprep.subr.bf16.mxu1 %v2350_v8  ;;  %v1944_v24 = vpop.eup %1943 }
 0x4cb   :  { %v805_v18 = vpop.xlane.xlu1 %804  ;;  %v608_v26 = vpack.c.bf16 %v1944_v24, %v1944_v24  ;;  %v605_v49 = vsel %vm428_vm2, %v1944_v24, 0.0 }
 0x4cc   :  { %1772 = vmatmul.mubr.msk.bf16.vlgmr.msra.gmra.mrb[4].mxu1 %vm428_vm2, %v498_v40  ;;  %v806_v23 = vsub.f32 %v2756_v38, %v805_v18 }
 0x4cd   :  { %1782 = vmatpush3.bf16.msra.mxu1 %v507_v21  ;;  %1783 = vmatprep.mubr.msk.bf16.mxu1 %vm2351_vm1, %v2350_v8 }
 0x4ce   :  { %1793 = vmatprep.subr.bf16.mxu1 %v2350_v8  ;;  %v807_v25 = vmul.f32 1.442695, %v806_v23 }
 0x4d0   :  { %1947 = vpow2.f32 %v807_v25 }
 0x4d2   :  { %v1946_v27 = vpop.eup %1945 }
 0x4d3   :  { %v928_v28 = vpop.xlane.xlu1 %927  ;;  %v710_v29 = vpack.c.bf16 %v1946_v27, %v1946_v27  ;;  %v707_v54 = vsel %vm428_vm2, %v1946_v27, 0.0 }
 0x4d4   :  { %1784 = vmatmul.mubr.msk.bf16.vlgmr.msra.gmra.mrb[8].mxu1 %vm428_vm2, %v608_v26  ;;  %v929_v33 = vsub.f32 %v2762_v45, %v928_v28 }
 0x4d5   :  { %1794 = vmatpush3.bf16.msra.mxu1 %v507_v21  ;;  %1795 = vmatprep.mubr.msk.bf16.mxu1 %vm2351_vm1, %v2350_v8 }
 0x4d6   :  { %1805 = vmatprep.subr.bf16.mxu1 %v2350_v8  ;;  %v930_v37 = vmul.f32 1.442695, %v929_v33 }
 0x4da   :  { %v1948_v35 = vpop.eup %1947 }
 0x4db   :  { %v1036_v30 = vpop.xlane.xlu1 %1035  ;;  %v812_v38 = vpack.c.bf16 %v1948_v35, %v1948_v35  ;;  %v809_v60 = vsel %vm428_vm2, %v1948_v35, 0.0 }
 0x4dc   :  { %v1037_v32 = vsub.f32 %v2768_v51, %v1036_v30  ;;  %1796 = vmatmul.mubr.msk.bf16.vlgmr.msra.gmra.mrb[12].mxu1 %vm428_vm2, %v710_v29 }
 0x4dd   :  { %1806 = vmatpush3.bf16.msra.mxu1 %v507_v21  ;;  %1807 = vmatprep.mubr.msk.bf16.mxu1 %vm2351_vm1, %v2350_v8 }
 0x4de   :  { %v1038_v34 = vmul.f32 1.442695, %v1037_v32  ;;  %1817 = vmatprep.subr.bf16.mxu1 %v2350_v8 }
 0x4e0   :  { %1949 = vpow2.f32 %v1038_v34 }
 0x4e1   :  { %1951 = vpow2.f32 %v930_v37 }
 0x4e3   :  { %v1138_v39 = vpop.xlane.xlu1 %1137 }
 0x4e4   :  { %v1139_v41 = vsub.f32 %v2776_v57, %v1138_v39  ;;  %1808 = vmatmul.mubr.msk.bf16.vlgmr.msra.gmra.mrb[16].mxu1 %vm428_vm2, %v812_v38 }
 0x4e5   :  { %1819 = vmatprep.mubr.msk.bf16.mxu1 %vm2351_vm1, %v2350_v8 }
 0x4e6   :  { %v1140_v42 = vmul.f32 1.442695, %v1139_v41 }
 0x4e8   :  { %1953 = vpow2.f32 %v1140_v42  ;;  %v1927_v42 = vld [vmem:[#allocation8] sm:$0xff]  }
 0x4e9   :  { %1860 = vmatpush3.bf16.msra.mxu0 %v1927_v42 }
 0x4ea   :  { %v1950_v43 = vpop.eup %1949  ;;  %1861 = vmatprep.subr.bf16.mxu0 %v2350_v8 }
 0x4eb   :  { %v1240_v44 = vpop.xlane.xlu1 %1239  ;;  %v1040_v45 = vsel %vm428_vm2, %v1950_v43, 0.0  ;;  %v1952_v50 = vpop.eup %1951  ;;  %v1043_v59 = vpack.c.bf16 %v1950_v43, %v1950_v43 }
 0x4ec   :  { %v1241_v46 = vsub.f32 %v2782_v3, %v1240_v44  ;;  %1041 = vadd.xlane.f32.xlu0 %v1040_v45  ;;  %v935_v55 = vpack.c.bf16 %v1952_v50, %v1952_v50  ;;  %v932_v61 = vsel %vm428_vm2, %v1952_v50, 0.0 }
 0x4ee   :  { %v1242_v47 = vmul.f32 1.442695, %v1241_v46 }
 0x4ef   :  { %v938_v48 = vpop.permute.xlu1 %937 }
 0x4f0   :  { %1955 = vpow2.f32 %v1242_v47  ;;  %v943_v51 = vsel %vm505_vm4, %v938_v48, 0  ;;  %606 = vadd.xlane.f32.xlu0 %v605_v49  ;;  %v1928_v48 = vld [vmem:[#allocation8 + $0x8] sm:$0xff]  }
 0x4f1   :  { %1818 = vmatpush3.bf16.msra.mxu1 %v943_v51  ;;  %1862 = vmatpush3.bf16.msra.mxu0 %v1928_v48 }
 0x4f2   :  { %v1954_v52 = vpop.eup %1953  ;;  %1829 = vmatprep.subr.bf16.mxu1 %v2350_v8  ;;  %1875 = vmatprep.subr.bf16.mxu0 %v2350_v8 }
 0x4f3   :  { %v1142_v53 = vsel %vm428_vm2, %v1954_v52, 0.0  ;;  %v1145_v2 = vpack.c.bf16 %v1954_v52, %v1954_v52 }
 0x4f4   :  { %1143 = vadd.xlane.f32.xlu1 %v1142_v53  ;;  %708 = vadd.xlane.f32.xlu0 %v707_v54 }
 0x4f5   :  { %1820 = vmatmul.mubr.msk.bf16.vlgmr.msra.gmra.mrb[20].mxu1 %vm428_vm2, %v935_v55 }
 0x4f6   :  { %1830 = vmatpush3.bf16.msra.mxu1 %v943_v51  ;;  %1831 = vmatprep.mubr.msk.bf16.mxu1 %vm2351_vm1, %v2350_v8 }
 0x4f7   :  { %1841 = vmatprep.subr.bf16.mxu1 %v2350_v8 }
 0x4f8   :  { %496 = vadd.xlane.f32.xlu1 %v495_v56 }
 0x4fa   :  { %v1956_v57 = vpop.eup %1955 }
 0x4fb   :  { %v1244_v58 = vsel %vm428_vm2, %v1956_v57, 0.0  ;;  %v1247_v3 = vpack.c.bf16 %v1956_v57, %v1956_v57 }
 0x4fc   :  { %1245 = vadd.xlane.f32.xlu0 %v1244_v58 }
 0x4fd   :  { %1832 = vmatmul.mubr.msk.bf16.vlgmr.msra.gmra.mrb[24].mxu1 %vm428_vm2, %v1043_v59 }
 0x4fe   :  { %1842 = vmatpush3.bf16.msra.mxu1 %v943_v51  ;;  %1843 = vmatprep.mubr.msk.bf16.mxu1 %vm2351_vm1, %v2350_v8 }
 0x4ff   :  { %1853 = vmatprep.subr.bf16.mxu1 %v2350_v8 }
 0x500   :  { %810 = vadd.xlane.f32.xlu0 %v809_v60 }
 0x504   :  { %933 = vadd.xlane.f32.xlu0 %v932_v61 }
 0x505   :  { %1844 = vmatmul.mubr.msk.bf16.vlgmr.msra.gmra.mrb[28].mxu1 %vm428_vm2, %v1145_v2 }
 0x506   :  { %1854 = vmatpush3.bf16.msra.mxu1 %v943_v51  ;;  %1855 = vmatprep.mubr.msk.bf16.mxu1 %vm2351_vm1, %v2350_v8 }
 0x507   :  { %1867 = vmatprep.subr.bf16.mxu1 %v2350_v8 }
 0x50d   :  { %1856 = vmatmul.mubr.msk.bf16.vlgmr.msra.gmra.mrb[32].mxu1 %vm428_vm2, %v1247_v3 }
 0x50e   :  { %1871 = vmatprep.mubr.msk.bf16.mxu1 %vm2351_vm1, %v2350_v8 }
 0x579   :  { %v1042_v4 = vpop.xlane.xlu0 %1041 }
 0x57d   :  { %v607_v5 = vpop.xlane.xlu0 %606 }
 0x57e   :  { %1957 = vrcp.f32 %v607_v5 }
 0x57f   :  { %1959 = vrcp.f32 %v1042_v4 }
 0x581   :  { %v1144_v27 = vpop.xlane.xlu1 %1143  ;;  %v709_v29 = vpop.xlane.xlu0 %708 }
 0x582   :  { %1961 = vrcp.f32 %v1144_v27 }
 0x583   :  { %1963 = vrcp.f32 %v709_v29 }
 0x588   :  { %v1958_v11 = vpop.eup %1957 }
 0x589   :  { %v1246_v32 = vpop.xlane.xlu0 %1245  ;;  %v1960_v33 = vpop.eup %1959 }
 0x58a   :  { %1965 = vrcp.f32 %v1246_v32 }
 0x58c   :  { %v1962_v44 = vpop.eup %1961 }
 0x58d   :  { %v811_v43 = vpop.xlane.xlu0 %810  ;;  %v1964_v49 = vpop.eup %1963 }
 0x58e   :  { %1967 = vrcp.f32 %v811_v43 }
 0x591   :  { %v934_v5 = vpop.xlane.xlu0 %933 }
 0x592   :  { %1969 = vrcp.f32 %v934_v5 }
 0x594   :  { %v1966_v55 = vpop.eup %1965 }
 0x598   :  { %v1968_v59 = vpop.eup %1967 }
 0x59f   :  { %v2840_v6 = vpop.f32.mrb[4].mxu1 }
 0x5a0   :  { %v1773_v7 = vpop.f32.mrb[5].mxu1 }
 0x5a1   :  { %v546_v9 = vpop.f32.mrb[6].mxu1  ;;  %v497_v7 = vpop.xlane.xlu1 %496 }
 0x5a2   :  { %v1774_v10 = vpop.f32.mrb[7].mxu1  ;;  %1971 = vrcp.f32 %v497_v7 }
 0x5a3   :  { %v1970_v10 = vpop.eup %1969 }
 0x5a7   :  { %v646_v12 = vpop.f32.mrb[8].mxu1 }
 0x5a8   :  { %v653_v13 = vmul.f32 %v1958_v11, %v646_v12  ;;  %v1785_v14 = vpop.f32.mrb[9].mxu1 }
 0x5a9   :  { %v649_v15 = vpop.f32.mrb[10].mxu1 }
 0x5aa   :  { %v654_v16 = vpack.c.bf16 %v653_v13, %v653_v13  ;;  %v1786_v17 = vpop.f32.mrb[11].mxu1 }
 0x5ac   :  { %860 = vrot.lane.b32.xlu1 %v654_v16, %s2342_s16  ;;  %v1972_v13 = vpop.eup %1971 }
 0x5ad   :  { %v550_v15 = vmul.f32 %v1972_v13, %v2840_v6 }
 0x5af   :  { %v748_v19 = vpop.f32.mrb[12].mxu1 }
 0x5b0   :  { %v1797_v20 = vpop.f32.mrb[13].mxu1  ;;  %v755_v51 = vmul.f32 %v1964_v49, %v748_v19 }
 0x5b1   :  { %v751_v21 = vpop.f32.mrb[14].mxu1 }
 0x5b2   :  { %v1798_v22 = vpop.f32.mrb[15].mxu1  ;;  %v756_v54 = vpack.c.bf16 %v755_v51, %v755_v51  ;;  %v551_v21 = vpack.c.bf16 %v550_v15, %v550_v15 }
 0x5b7   :  { %v850_v40 = vpop.f32.mrb[16].mxu1 }
 0x5b8   :  { %v1809_v18 = vpop.f32.mrb[17].mxu1  ;;  %v857_v61 = vmul.f32 %v1968_v59, %v850_v40  ;;  %v1936_v59 = vld [vmem:[#allocation13 + $0x18] sm:$0xff]  }
 0x5b9   :  { %v853_v23 = vpop.f32.mrb[18].mxu1 }
 0x5ba   :  { %v1810_v24 = vpop.f32.mrb[19].mxu1  ;;  %v858_v4 = vpack.c.bf16 %v857_v61, %v857_v61 }
 0x5c8   :  { %v979_v25 = vpop.f32.mrb[20].mxu1 }
 0x5c9   :  { %v1821_v26 = vpop.f32.mrb[21].mxu1  ;;  %v986_v11 = vmul.f32 %v1970_v10, %v979_v25 }
 0x5ca   :  { %v982_v28 = vpop.f32.mrb[22].mxu1 }
 0x5cb   :  { %v1822_v30 = vpop.f32.mrb[23].mxu1  ;;  %v987_v16 = vpack.c.bf16 %v986_v11, %v986_v11 }
 0x5d0   :  { %v1081_v34 = vpop.f32.mrb[24].mxu1 }
 0x5d1   :  { %v1088_v35 = vmul.f32 %v1960_v33, %v1081_v34  ;;  %v1833_v37 = vpop.f32.mrb[25].mxu1 }
 0x5d2   :  { %v1084_v38 = vpop.f32.mrb[26].mxu1 }
 0x5d3   :  { %v1089_v39 = vpack.c.bf16 %v1088_v35, %v1088_v35  ;;  %v1834_v41 = vpop.f32.mrb[27].mxu1 }
 0x5d4   :  { %v1932_v41 = vld [vmem:[#allocation11 + $0x8] sm:$0xff]  }
 0x5d5   :  { %1295 = vrot.lane.b32.xlu0 %v1089_v39, %s2342_s16  ;;  %v1931_v39 = vld [vmem:[#allocation10 + $0x8] sm:$0xff]  }
 0x5d8   :  { %v1183_v45 = vpop.f32.mrb[28].mxu1 }
 0x5d9   :  { %v1190_v46 = vmul.f32 %v1962_v44, %v1183_v45  ;;  %v1845_v47 = vpop.f32.mrb[29].mxu1 }
 0x5da   :  { %v1186_v50 = vpop.f32.mrb[30].mxu1 }
 0x5db   :  { %v1191_v52 = vpack.c.bf16 %v1190_v46, %v1190_v46  ;;  %v1846_v53 = vpop.f32.mrb[31].mxu1 }
 0x5dc   :  { %v1681_v53 = vld [vmem:[#allocation16] ss:$0 sm:$0xff] }
 0x5dd   :  { %1298 = vrot.lane.b32.xlu1 %v1191_v52, %s2357_s29 }
 0x5e0   :  { %v1285_v56 = vpop.f32.mrb[32].mxu1 }
 0x5e1   :  { %v1292_v57 = vmul.f32 %v1966_v55, %v1285_v56  ;;  %v1857_v58 = vpop.f32.mrb[33].mxu1  ;;  %863 = vrot.lane.b32.xlu1 %v756_v54, %s2357_s29 }
 0x5e2   :  { %v1288_v60 = vpop.f32.mrb[34].mxu1  ;;  %v1935_v58 = vld [vmem:[#allocation13 + $0x10] sm:$0xff]  }
 0x5e3   :  { %v1293_v2 = vpack.c.bf16 %v1292_v57, %v1292_v57  ;;  %v1858_v3 = vpop.f32.mrb[35].mxu1 }
 0x5e5   :  { %1301 = vrot.lane.b32.xlu0 %v1293_v2, %s2358_s17 }
 0x5e9   :  { %866 = vrot.lane.b32.xlu0 %v858_v4, %s2358_s17 }
 0x61e   :  { %v861_v9 = vpop.permute.xlu1 %860 }
 0x61f   :  { %v870_v18 = vsel %vm428_vm2, %v551_v21, %v861_v9 }
 0x647   :  { %v1296_v14 = vpop.permute.xlu0 %1295 }
 0x648   :  { %v1305_v17 = vsel %vm428_vm2, %v987_v16, %v1296_v14 }
 0x64f   :  { %v1299_v12 = vpop.permute.xlu1 %1298 }
 0x650   :  { %v1307_v19 = vsel %vm431_vm5, %v1305_v17, %v1299_v12 }
 0x653   :  { %v864_v22 = vpop.permute.xlu1 %863 }
 0x654   :  { %v872_v23 = vsel %vm431_vm5, %v870_v18, %v864_v22 }
 0x657   :  { %v1302_v20 = vpop.permute.xlu0 %1301 }
 0x658   :  { %v1309_v40 = vsel %vm873_vm6, %v1307_v19, %v1302_v20 }
 0x659   :  { %v1311_v24 = vrot.slane %v1309_v40, 4 }
 0x65b   :  { %v867_v25 = vpop.permute.xlu0 %866 }
 0x65c   :  { %v875_v26 = vsel %vm873_vm6, %v872_v23, %v867_v25 }
 0x65d   :  { %v1313_v6 = vsel %vm505_vm4, %v875_v26, %v1311_v24 }
 0x65e   :  { %1864 = vmatmul.mubr.msk.bf16.vlgmr.msra.gmra.mrb[36].mxu0 %vm226_vm0, %v1313_v6 }
 0x65f   :  { %1879 = vmatprep.mubr.msk.bf16.mxu0 %vm2351_vm1, %v2350_v8 }
 0x731   :  { %v1366_v27 = vpop.f32.mrb[36].mxu0 }
 0x732   :  { %v2856_v28 = vadd.f32 %v1366_v27, %v2653_v0  ;;  %v1865_v29 = vpop.f32.mrb[37].mxu0  ;;  %v1929_v0 = vld [vmem:[#allocation10] sm:$0xff]  }
 0x733   :  { %v1369_v30 = vpop.f32.mrb[38].mxu0  ;;  %1868 = vmatpush3.bf16.msra.mxu1 %v1929_v0 }
 0x734   :  { %v2859_v32 = vadd.f32 %v1369_v30, %v2655_v1  ;;  %v1866_v33 = vpop.f32.mrb[39].mxu0  ;;  %v1376_v34 = vmul.f32 %v2856_v28, %v2856_v28  ;;  %v1930_v1 = vld [vmem:[#allocation11] sm:$0xff]   ;;  %1869 = vmatprep.subr.bf16.mxu1 %v2350_v8 }
 0x735   :  { %1876 = vmatpush3.bf16.msra.mxu0 %v1930_v1 }
 0x736   :  { %v1378_v35 = vsel %vm226_vm0, %v1376_v34, 0.0  ;;  %v1377_v37 = vmul.f32 %v2859_v32, %v2859_v32  ;;  %1877 = vmatprep.subr.bf16.mxu0 %v2350_v8 }
 0x737   :  { %1379 = vadd.xlane.f32.xlu1 %v1378_v35  ;;  %1870 = vmatpush3.bf16.msra.mxu1 %v1931_v39 }
 0x738   :  { %v1381_v38 = vsel %vm226_vm0, %v1377_v37, 0.0  ;;  %1883 = vmatprep.subr.bf16.mxu1 %v2350_v8 }
 0x739   :  { %1382 = vadd.xlane.f32.xlu0 %v1381_v38  ;;  %1878 = vmatpush3.bf16.msra.mxu0 %v1932_v41 }
 0x748   :  { %424 = vrot.lane.b32.xlu1 %v2685_v36, %s2354_s23 }
 0x74f   :  { %422 = vrot.lane.b32.xlu0 %v2683_v31, %s2354_s23 }
 0x7c4   :  { %v1380_v42 = vpop.xlane.xlu1 %1379 }
 0x7c5   :  { %v1384_v43 = vmul.f32 0.03125, %v1380_v42 }
 0x7c6   :  { %v1383_v36 = vpop.xlane.xlu0 %1382 }
 0x7c7   :  { %v1386_v44 = vadd.f32 1e-06, %v1384_v43  ;;  %v1385_v45 = vmul.f32 0.03125, %v1383_v36 }
 0x7c8   :  { %v425_v31 = vpop.permute.xlu1 %424 }
 0x7c9   :  { %1973 = vrsqrt.f32 %v1386_v44  ;;  %v1387_v46 = vadd.f32 1e-06, %v1385_v45  ;;  %v430_v47 = vsel %vm428_vm2, %v2701_v63, %v425_v31  ;;  %v1934_v63 = vld [vmem:[#allocation13 + $0x8] sm:$0xff]  }
 0x7ca   :  { %433 = vst.msk [vmem:[#allocation24 + $0x8] sm:$0xff] %vm431_vm5, %v430_v47  ;;  %v423_v48 = vpop.permute.xlu0 %422 }
 0x7cb   :  { %1975 = vrsqrt.f32 %v1387_v46  ;;  %v429_v49 = vsel %vm428_vm2, %v2699_v62, %v423_v48  ;;  %v1933_v62 = vld [vmem:[#allocation13] sm:$0xff]  }
 0x7cc   :  { %432 = vst.msk [vmem:[#allocation24] sm:$0xff] %vm431_vm5, %v429_v49 }
 0x7d3   :  { %v1974_v50 = vpop.eup %1973 }
 0x7d4   :  { %v1390_v51 = vmul.f32 %v1974_v50, %v2856_v28 }
 0x7d5   :  { %v1976_v52 = vpop.eup %1975 }
 0x7d6   :  { %v1391_v54 = vmul.f32 %v1976_v52, %v2859_v32  ;;  %v1398_v55 = vmul.f32 %v1681_v53, %v1390_v51 }
 0x7d8   :  { %v1399_v56 = vmul.f32 %v1681_v53, %v1391_v54 }
 0x7da   :  { %v1400_v57 = vpack.c.bf16 %v1399_v56, %v1398_v55 }
 0x7dc   :  { %1872 = vmatmul.mubr.msk.bf16.vlgmr.msra.gmra.mrb[36].mxu1 %vm226_vm0, %v1400_v57  ;;  %1880 = vmatmul.mubr.msk.bf16.vlgmr.msra.gmra.mrb[40].mxu0 %vm226_vm0, %v1400_v57 }
 0x7dd   :  { %1891 = vmatprep.mubr.msk.bf16.mxu1 %vm2351_vm1, %v2350_v8  ;;  %1884 = vmatpush3.bf16.msra.mxu1 %v1933_v62 }
 0x7de   :  { %1885 = vmatprep.subr.bf16.mxu1 %v2350_v8 }
 0x7e1   :  { %1886 = vmatpush3.bf16.msra.mxu1 %v1934_v63 }
 0x7e2   :  { %1887 = vmatprep.subr.bf16.mxu1 %v2350_v8 }
 0x7e5   :  { %1888 = vmatpush3.bf16.msra.mxu1 %v1935_v58 }
 0x7e6   :  { %1889 = vmatprep.subr.bf16.mxu1 %v2350_v8 }
 0x7e9   :  { %1890 = vmatpush3.bf16.msra.mxu1 %v1936_v59 }
 0x8af   :  { %v1454_v60 = vpop.f32.mrb[36].mxu1  ;;  %v1511_v61 = vpop.f32.mrb[40].mxu0 }
 0x8b0   :  { %v1688_v2 = vmul.f32 -1.442695, %v1454_v60  ;;  %v1873_v3 = vpop.f32.mrb[37].mxu1  ;;  %v1881_v4 = vpop.f32.mrb[41].mxu0 }
 0x8b1   :  { %v1457_v5 = vpop.f32.mrb[38].mxu1  ;;  %v1514_v7 = vpop.f32.mrb[42].mxu0 }
 0x8b2   :  { %1977 = vpow2.f32 %v1688_v2  ;;  %v1689_v9 = vmul.f32 -1.442695, %v1457_v5  ;;  %v1874_v10 = vpop.f32.mrb[39].mxu1  ;;  %v1882_v11 = vpop.f32.mrb[43].mxu0 }
 0x8b4   :  { %1979 = vpow2.f32 %v1689_v9 }
 0x8bc   :  { %v1978_v12 = vpop.eup %1977 }
 0x8bd   :  { %v1524_v13 = vadd.f32 1.0, %v1978_v12 }
 0x8be   :  { %v1980_v14 = vpop.eup %1979 }
 0x8bf   :  { %1981 = vrcp.f32 %v1524_v13  ;;  %v1525_v15 = vadd.f32 1.0, %v1980_v14 }
 0x8c1   :  { %1983 = vrcp.f32 %v1525_v15 }
 0x8c9   :  { %v1982_v8 = vpop.eup %1981 }
 0x8ca   :  { %v1530_v16 = vmul.f32 %v1982_v8, %v1454_v60 }
 0x8cb   :  { %v1984_v17 = vpop.eup %1983 }
 0x8cc   :  { %v1532_v19 = vmul.f32 %v1530_v16, %v1511_v61  ;;  %v1531_v20 = vmul.f32 %v1984_v17, %v1457_v5 }
 0x8ce   :  { %v1533_v21 = vmul.f32 %v1531_v20, %v1514_v7 }
 0x8d0   :  { %v1534_v22 = vpack.c.bf16 %v1533_v21, %v1532_v19 }
 0x8d2   :  { %1892 = vmatmul.mubr.msk.bf16.vlgmr.msra.gmra.mrb[40].mxu1 %vm1567_vm7, %v1534_v22 }
 0x8d3   :  { %2282 = shalt.err (!%p2279_p10)
}
 0x8d4   :  { %s2283_s4 = scalar_lea.hbm %s2937_s14, 256 }
 0x8d5   :  { %p2284_p11 = scmp.ne.s32.totalorder %s2937_s14, %s2283_s4  ;;  %p2287_p12 = scmp.lt.u32.totalorder %s2283_s4, %s2937_s14 }
 0x8d7   :  { %p2289_p13 = pnand %p2287_p12, %p2284_p11 }
 0x8d9   :  { %2292 = shalt.err (!%p2289_p13)
}
 0x8da   :  { %1639 = dma.vmem_to_hbm [thread:$0]  %s1634_s0, 256, %s2937_s14, [#allocation25], %s2341_s22, %s2341_s22, %s2342_s16  }
 0x8db   :  { %s2360_s25 = smov [#allocation23]  }
 0x8dc   :  { %s1621_s9 = sshll.u32 %s2360_s25, 4  ;;  %s1622_s9 = int_to_ptr.vmem [resolvable:$true] %s1621_s9 }
 0x8dd   :  { %s2293_s2 = scalar_lea.vmem %s1622_s9, 256  ;;  %p2298_p1 = scmp.lt.s32.totalorder %s1622_s9, %s1622_s9 }
 0x8de   :  { %p2294_p0 = scmp.ne.s32.totalorder %s1622_s9, %s2293_s2  ;;  %p2299_p2 = scmp.lt.s32.totalorder %s2293_s2, %s2293_s2 }
 0x8e0   :  { %p2300_p3 = por %p2299_p2, %p2298_p1 }
 0x8e2   :  { %p2301_p4 = pnand %p2300_p3, %p2294_p0 }
 0x9a5   :  { %v1605_v40 = vpop.f32.mrb[40].mxu1 }
 0x9a6   :  { %v1612_v18 = vadd.f32 %v1605_v40, %v2856_v28  ;;  %v1893_v23 = vpop.f32.mrb[41].mxu1 }
 0x9a7   :  { %v1608_v24 = vpop.f32.mrb[42].mxu1 }
 0x9a8   :  { %1614 = vst.msk [vmem:[#allocation23] sm:$0xff] %vm226_vm0, %v1612_v18  ;;  %v1613_v25 = vadd.f32 %v1608_v24, %v2859_v32  ;;  %v1894_v26 = vpop.f32.mrb[43].mxu1 }
 0x9aa   :  { %1615 = vst.msk [vmem:[#allocation23 + $0x8] sm:$0xff] %vm226_vm0, %v1613_v25 }
 0x9ab   :  { %2304 = shalt.err (!%p2301_p4)
}
 0x9ac   :  { %s2305_s20 = scalar_lea.hbm %s2936_s13, 256 }
 0x9ad   :  { %p2306_p5 = scmp.ne.s32.totalorder %s2936_s13, %s2305_s20  ;;  %p2309_p6 = scmp.lt.u32.totalorder %s2305_s20, %s2936_s13 }
 0x9af   :  { %p2311_p7 = pnand %p2309_p6, %p2306_p5 }
 0x9b1   :  { %2314 = shalt.err (!%p2311_p7)
}
 0x9b2   :  { %1627 = dma.vmem_to_hbm [thread:$0]  %s1622_s9, 256, %s2936_s13, [#allocation4], %s2341_s22, %s2341_s22, %s2342_s16  }
 0x9b3   :  { %2329 = dma.done.wait [#allocation4], 256  }
 0x9b4   :  { %2330 = vsyncadd [#allocation4], 4294967040 }
 0x9b5   :  { %2331 = dma.done.wait [#allocation25], 256  }
 0x9b6   :  { %2332 = vsyncadd [#allocation25], 4294967040 }
 0x9b7   :  { %1646 = vsyncpa [#allocation3], 1 }
 0x9b8   :  { %1647 = vsyncpa [#allocation6], 1 }
 0x9b9   :  { %1648 = vsyncpa [#allocation9], 1 }
 0x9ba   :  { %1649 = vsyncpa [#allocation12], 1 }
 0x9bb   :  { %1650 = vsyncpa [#allocation15], 1 }
 0x9bc   :  { %1651 = vsyncpa [#allocation18], 1 }
 0x9bd   :  { %1652 = vsyncpa [#allocation21], 1 }
 0x9be   :  { %1653 = vsyncpa [#allocation4], 1 }
 0x9bf   :  { %1654 = vsyncpa [#allocation25], 1 }

</bundles_post_ra>
